<compile_context>
chip_gen: v7x
topology: tpu7x:2x2x1
jax: 0.10.0
libtpu: 0.0.40
codegen_flags: <defaults>
</compile_context>

<pallas_src>
import numpy as np
import jax
import jax.numpy as jnp
from jax.experimental import pallas as pl
from jax.experimental.pallas import tpu as pltpu

NEG_SLOPE = 0.2      # LeakyReLU(0.2)
BN_EPS = 0.8         # nn.BatchNorm2d(out_filters, 0.8) -> positional arg is eps


# ------------------------------ Pallas kernel ------------------------------ #

def _discriminator_kernel(patches1_ref, w1_ref, b1_ref,
                          p2_ref, w2_ref, aux2_ref,
                          p3_ref, w3_ref, aux3_ref,
                          p4_ref, w4_ref, aux4_ref,
                          fc_w_ref, fc_b_ref, o_ref):
    """Entire Discriminator forward; activations never leave VMEM."""
    f32 = jnp.float32

    # -- block 1: Conv(cin->16, k3 s2 p1) + bias + LeakyReLU (flag_BN=False) --
    a = jnp.dot(patches1_ref[...], w1_ref[...], preferred_element_type=f32)
    a = a + b1_ref[...]
    a = jnp.maximum(a, NEG_SLOPE * a)                 # LeakyReLU(0.2)
    # Dropout2d(0.25): identity at inference.

    # -- blocks 2-4: stride-2 conv as 9 gather(P_k) + GEMM(W_k) taps ----------
    def block(a, p_ref, w_ref, aux_ref):
        m_out = p_ref.shape[1]
        cout = w_ref.shape[2]
        acc = jnp.zeros((m_out, cout), f32)
        for k in range(9):                            # statically unrolled taps
            g = jnp.dot(p_ref[k], a, preferred_element_type=f32)       # row gather
            acc = acc + jnp.dot(g, w_ref[k], preferred_element_type=f32)
        y = acc + aux_ref[0:1, :]                     # conv bias
        y = jnp.maximum(y, NEG_SLOPE * y)             # LeakyReLU(0.2)
        return y * aux_ref[1:2, :] + aux_ref[2:3, :]  # eval-mode BatchNorm affine

    a = block(a, p2_ref, w2_ref, aux2_ref)            # (N*8*8,16) -> (N*4*4,32)
    a = block(a, p3_ref, w3_ref, aux3_ref)            # -> (N*2*2,64)
    a = block(a, p4_ref, w4_ref, aux4_ref)            # -> (N*1*1,128)

    # -- adv layer: Linear(128 -> 1) + Sigmoid --------------------------------
    logit = jnp.dot(a, fc_w_ref[...], preferred_element_type=f32) + fc_b_ref[...]
    sig = pl.reciprocal(1.0 + jnp.exp(-logit))        # sigmoid (recip on EUP path)
    # Lane-dense output: broadcast the (N,1) result across all 128 lanes.
    o_ref[...] = jnp.broadcast_to(sig, o_ref.shape)


# ------------------------------- wrapper glue ------------------------------ #

def im2col(x_nhwc, ksize=3, stride=2, pad=1):
    """Patches for the first conv: (N*OH*OW, ksize*ksize*C), (kh, kw, c) cols."""
    N, H, W, C = x_nhwc.shape
    xp = jnp.pad(x_nhwc, ((0, 0), (pad, pad), (pad, pad), (0, 0)))
    OH = (H + 2 * pad - ksize) // stride + 1
    OW = (W + 2 * pad - ksize) // stride + 1
    cols = []
    for kh in range(ksize):
        for kw in range(ksize):
            cols.append(xp[:, kh:kh + stride * OH:stride,
                           kw:kw + stride * OW:stride, :])
    patches = jnp.stack(cols, axis=3)                 # (N, OH, OW, 9, C)
    return patches.reshape(N * OH * OW, ksize * ksize * C)


def _gather_mats(batch, h, w):
    """0/1 matrices (9, N*OH*OW, N*H*W): per-tap row gather for a s2 p1 3x3 conv."""
    oh, ow = h // 2, w // 2
    p = np.zeros((9, batch * oh * ow, batch * h * w), np.float32)
    for kh in range(3):
        for kw in range(3):
            k = 3 * kh + kw
            for n in range(batch):
                for i in range(oh):
                    hh = 2 * i + kh - 1
                    if not 0 <= hh < h:
                        continue
                    for j in range(ow):
                        ww = 2 * j + kw - 1
                        if 0 <= ww < w:
                            p[k, (n * oh + i) * ow + j, (n * h + hh) * w + ww] = 1.0
    return jnp.asarray(p)


def init_params(key, in_channels, image_size):
    chans = [in_channels, 16, 32, 64, 128]
    convs = []
    for i in range(4):
        key, k1, k2, k3, k4 = jax.random.split(key, 5)
        cin, cout = chans[i], chans[i + 1]
        p = dict(w=0.05 * jax.random.normal(k1, (3, 3, cin, cout), jnp.float32),  # HWIO
                 b=0.05 * jax.random.normal(k2, (1, cout), jnp.float32))
        if i > 0:   # discriminator_block(..., flag_BN=True) for blocks 2-4
            p["gamma"] = 1.0 + 0.1 * jax.random.normal(k3, (1, cout), jnp.float32)
            p["beta"] = 0.1 * jax.random.normal(k4, (1, cout), jnp.float32)
        convs.append(p)
    ds = image_size // 2 ** 4
    key, k1, k2 = jax.random.split(key, 3)
    return dict(convs=convs,
                fc_w=0.05 * jax.random.normal(k1, (128 * ds * ds, 1), jnp.float32),
                fc_b=0.05 * jax.random.normal(k2, (1, 1), jnp.float32))


@jax.jit
def discriminator_forward(params, img_nchw):
    n, _, h, w = img_nchw.shape
    assert h == 16 and w == 16, "fused kernel written for OPT.image_size = 16 (ds=1)"

    x = jnp.transpose(img_nchw, (0, 2, 3, 1)).astype(jnp.float32)    # NCHW -> NHWC
    patches1 = im2col(x)                                             # (n*64, 9*cin)

    c1 = params["convs"][0]
    args = [patches1, c1["w"].reshape(-1, c1["w"].shape[-1]), c1["b"]]

    hh, ww = h // 2, w // 2                                          # spatial into block 2
    for p in params["convs"][1:]:
        cin, cout = p["w"].shape[2], p["w"].shape[3]
        scale = p["gamma"] / jnp.sqrt(1.0 + BN_EPS)                  # running var=1, mean=0
        shift = p["beta"]
        args += [_gather_mats(n, hh, ww),                            # compile-time consts
                 p["w"].reshape(9, cin, cout),
                 jnp.concatenate([p["b"], scale, shift], axis=0)]    # (3, cout)
        hh, ww = hh // 2, ww // 2
    args += [params["fc_w"], params["fc_b"]]

    out = pl.pallas_call(
        _discriminator_kernel,
        out_shape=jax.ShapeDtypeStruct((n, 128), jnp.float32),
        in_specs=[pl.BlockSpec(memory_space=pltpu.MemorySpace.VMEM)] * len(args),
        out_specs=pl.BlockSpec(memory_space=pltpu.MemorySpace.VMEM),
    )(*args)
    return out[:, :1]                                                # validity (n, 1)


def reference_forward(params, img_nchw):
    x = jnp.transpose(img_nchw, (0, 2, 3, 1)).astype(jnp.float32)
    for p in params["convs"]:
        y = jax.lax.conv_general_dilated(
            x, p["w"], window_strides=(2, 2), padding=((1, 1), (1, 1)),
            dimension_numbers=("NHWC", "HWIO", "NHWC"),
            precision=jax.lax.Precision.HIGHEST)
        y = y + p["b"].reshape(1, 1, 1, -1)
        y = jnp.where(y > 0, y, NEG_SLOPE * y)
        if "gamma" in p:
            scale = p["gamma"] / jnp.sqrt(1.0 + BN_EPS)
            x = y * scale.reshape(1, 1, 1, -1) + p["beta"].reshape(1, 1, 1, -1)
        else:
            x = y
    flat = x.reshape(x.shape[0], -1)
    logits = jnp.dot(flat, params["fc_w"],
                     precision=jax.lax.Precision.HIGHEST) + params["fc_b"]
    return jax.nn.sigmoid(logits)


if __name__ == "__main__":
    # OPT.number_of_channels = 4, OPT.image_size = 16
    NUM_CHANNELS, IMAGE_SIZE, BATCH = 4, 16, 2

    key = jax.random.PRNGKey(0)
    key, pkey, xkey = jax.random.split(key, 3)
    params = init_params(pkey, NUM_CHANNELS, IMAGE_SIZE)
    img = jax.random.normal(xkey, (BATCH, NUM_CHANNELS, IMAGE_SIZE, IMAGE_SIZE),
                            jnp.float32)

    validity = jax.block_until_ready(discriminator_forward(params, img))
    ref = jax.block_until_ready(reference_forward(params, img))

    assert validity.shape == (BATCH, 1), validity.shape
    assert bool(jnp.all(jnp.isfinite(validity)))
    np.testing.assert_allclose(np.asarray(validity), np.asarray(ref),
                               rtol=1e-2, atol=1e-2)
    print("KERNEL_OK")
</pallas_src>

<mosaic_0001>
module attributes {stable_mosaic.version = 11 : i64} {
  func.func @_discriminator_kernel(%arg0: memref<128x36xf32, #tpu.memory_space<vmem>>, %arg1: memref<36x16xf32, #tpu.memory_space<vmem>>, %arg2: memref<1x16xf32, #tpu.memory_space<vmem>>, %arg3: memref<9x32x128xf32, #tpu.memory_space<vmem>>, %arg4: memref<9x16x32xf32, #tpu.memory_space<vmem>>, %arg5: memref<3x32xf32, #tpu.memory_space<vmem>>, %arg6: memref<9x8x32xf32, #tpu.memory_space<vmem>>, %arg7: memref<9x32x64xf32, #tpu.memory_space<vmem>>, %arg8: memref<3x64xf32, #tpu.memory_space<vmem>>, %arg9: memref<9x2x8xf32, #tpu.memory_space<vmem>>, %arg10: memref<9x64x128xf32, #tpu.memory_space<vmem>>, %arg11: memref<3x128xf32, #tpu.memory_space<vmem>>, %arg12: memref<128x1xf32, #tpu.memory_space<vmem>>, %arg13: memref<1x1xf32, #tpu.memory_space<vmem>>, %arg14: memref<2x128xf32, #tpu.memory_space<vmem>>) attributes {dimension_semantics = [], scalar_prefetch = 0 : i64, scratch_operands = 0 : i64, tpu.core_type = #tpu.core_type<tc>} {
    %c0 = arith.constant 0 : index
    %c0_0 = arith.constant 0 : index
    %0 = vector.load %arg0[%c0, %c0_0] : memref<128x36xf32, #tpu.memory_space<vmem>>, vector<128x36xf32>
    %c0_1 = arith.constant 0 : index
    %c0_2 = arith.constant 0 : index
    %1 = vector.load %arg1[%c0_1, %c0_2] : memref<36x16xf32, #tpu.memory_space<vmem>>, vector<36x16xf32>
    %cst = arith.constant dense<0.000000e+00> : vector<128x16xf32>
    %2 = tpu.matmul %0, %1, %cst {dimension_numbers = #tpu.dot_dimension_numbers<[1], [0], [0], [1], [0, 0, 1, 1], [], []>} : vector<128x36xf32>, vector<36x16xf32>, vector<128x16xf32> -> vector<128x16xf32>
    %c0_3 = arith.constant 0 : index
    %c0_4 = arith.constant 0 : index
    %3 = vector.load %arg2[%c0_3, %c0_4] : memref<1x16xf32, #tpu.memory_space<vmem>>, vector<1x16xf32>
    %4 = vector.broadcast %3 : vector<1x16xf32> to vector<128x16xf32>
    %5 = arith.addf %2, %4 : vector<128x16xf32>
    %cst_5 = arith.constant 2.000000e-01 : f32
    %6 = vector.broadcast %cst_5 : f32 to vector<128x16xf32>
    %7 = arith.mulf %6, %5 : vector<128x16xf32>
    %8 = arith.maximumf %5, %7 : vector<128x16xf32>
    %cst_6 = arith.constant 0.000000e+00 : f32
    %9 = vector.broadcast %cst_6 : f32 to vector<32x32xf32>
    %c0_7 = arith.constant 0 : index
    %c0_8 = arith.constant 0 : index
    %c0_9 = arith.constant 0 : index
    %10 = vector.load %arg3[%c0_7, %c0_8, %c0_9] : memref<9x32x128xf32, #tpu.memory_space<vmem>>, vector<1x32x128xf32>
    %11 = vector.shape_cast %10 : vector<1x32x128xf32> to vector<32x128xf32>
    %cst_10 = arith.constant dense<0.000000e+00> : vector<32x16xf32>
    %12 = tpu.matmul %11, %8, %cst_10 {dimension_numbers = #tpu.dot_dimension_numbers<[1], [0], [0], [1], [0, 0, 1, 1], [], []>} : vector<32x128xf32>, vector<128x16xf32>, vector<32x16xf32> -> vector<32x16xf32>
    %c0_11 = arith.constant 0 : index
    %c0_12 = arith.constant 0 : index
    %c0_13 = arith.constant 0 : index
    %13 = vector.load %arg4[%c0_11, %c0_12, %c0_13] : memref<9x16x32xf32, #tpu.memory_space<vmem>>, vector<1x16x32xf32>
    %14 = vector.shape_cast %13 : vector<1x16x32xf32> to vector<16x32xf32>
    %cst_14 = arith.constant dense<0.000000e+00> : vector<32x32xf32>
    %15 = tpu.matmul %12, %14, %cst_14 {dimension_numbers = #tpu.dot_dimension_numbers<[1], [0], [0], [1], [0, 0, 1, 1], [], []>} : vector<32x16xf32>, vector<16x32xf32>, vector<32x32xf32> -> vector<32x32xf32>
    %16 = arith.addf %9, %15 : vector<32x32xf32>
    %c1 = arith.constant 1 : index
    %c0_15 = arith.constant 0 : index
    %c0_16 = arith.constant 0 : index
    %17 = vector.load %arg3[%c1, %c0_15, %c0_16] : memref<9x32x128xf32, #tpu.memory_space<vmem>>, vector<1x32x128xf32>
    %18 = vector.shape_cast %17 : vector<1x32x128xf32> to vector<32x128xf32>
    %cst_17 = arith.constant dense<0.000000e+00> : vector<32x16xf32>
    %19 = tpu.matmul %18, %8, %cst_17 {dimension_numbers = #tpu.dot_dimension_numbers<[1], [0], [0], [1], [0, 0, 1, 1], [], []>} : vector<32x128xf32>, vector<128x16xf32>, vector<32x16xf32> -> vector<32x16xf32>
    %c1_18 = arith.constant 1 : index
    %c0_19 = arith.constant 0 : index
    %c0_20 = arith.constant 0 : index
    %20 = vector.load %arg4[%c1_18, %c0_19, %c0_20] : memref<9x16x32xf32, #tpu.memory_space<vmem>>, vector<1x16x32xf32>
    %21 = vector.shape_cast %20 : vector<1x16x32xf32> to vector<16x32xf32>
    %cst_21 = arith.constant dense<0.000000e+00> : vector<32x32xf32>
    %22 = tpu.matmul %19, %21, %cst_21 {dimension_numbers = #tpu.dot_dimension_numbers<[1], [0], [0], [1], [0, 0, 1, 1], [], []>} : vector<32x16xf32>, vector<16x32xf32>, vector<32x32xf32> -> vector<32x32xf32>
    %23 = arith.addf %16, %22 : vector<32x32xf32>
    %c2 = arith.constant 2 : index
    %c0_22 = arith.constant 0 : index
    %c0_23 = arith.constant 0 : index
    %24 = vector.load %arg3[%c2, %c0_22, %c0_23] : memref<9x32x128xf32, #tpu.memory_space<vmem>>, vector<1x32x128xf32>
    %25 = vector.shape_cast %24 : vector<1x32x128xf32> to vector<32x128xf32>
    %cst_24 = arith.constant dense<0.000000e+00> : vector<32x16xf32>
    %26 = tpu.matmul %25, %8, %cst_24 {dimension_numbers = #tpu.dot_dimension_numbers<[1], [0], [0], [1], [0, 0, 1, 1], [], []>} : vector<32x128xf32>, vector<128x16xf32>, vector<32x16xf32> -> vector<32x16xf32>
    %c2_25 = arith.constant 2 : index
    %c0_26 = arith.constant 0 : index
    %c0_27 = arith.constant 0 : index
    %27 = vector.load %arg4[%c2_25, %c0_26, %c0_27] : memref<9x16x32xf32, #tpu.memory_space<vmem>>, vector<1x16x32xf32>
    %28 = vector.shape_cast %27 : vector<1x16x32xf32> to vector<16x32xf32>
    %cst_28 = arith.constant dense<0.000000e+00> : vector<32x32xf32>
    %29 = tpu.matmul %26, %28, %cst_28 {dimension_numbers = #tpu.dot_dimension_numbers<[1], [0], [0], [1], [0, 0, 1, 1], [], []>} : vector<32x16xf32>, vector<16x32xf32>, vector<32x32xf32> -> vector<32x32xf32>
    %30 = arith.addf %23, %29 : vector<32x32xf32>
    %c3 = arith.constant 3 : index
    %c0_29 = arith.constant 0 : index
    %c0_30 = arith.constant 0 : index
    %31 = vector.load %arg3[%c3, %c0_29, %c0_30] : memref<9x32x128xf32, #tpu.memory_space<vmem>>, vector<1x32x128xf32>
    %32 = vector.shape_cast %31 : vector<1x32x128xf32> to vector<32x128xf32>
    %cst_31 = arith.constant dense<0.000000e+00> : vector<32x16xf32>
    %33 = tpu.matmul %32, %8, %cst_31 {dimension_numbers = #tpu.dot_dimension_numbers<[1], [0], [0], [1], [0, 0, 1, 1], [], []>} : vector<32x128xf32>, vector<128x16xf32>, vector<32x16xf32> -> vector<32x16xf32>
    %c3_32 = arith.constant 3 : index
    %c0_33 = arith.constant 0 : index
    %c0_34 = arith.constant 0 : index
    %34 = vector.load %arg4[%c3_32, %c0_33, %c0_34] : memref<9x16x32xf32, #tpu.memory_space<vmem>>, vector<1x16x32xf32>
    %35 = vector.shape_cast %34 : vector<1x16x32xf32> to vector<16x32xf32>
    %cst_35 = arith.constant dense<0.000000e+00> : vector<32x32xf32>
    %36 = tpu.matmul %33, %35, %cst_35 {dimension_numbers = #tpu.dot_dimension_numbers<[1], [0], [0], [1], [0, 0, 1, 1], [], []>} : vector<32x16xf32>, vector<16x32xf32>, vector<32x32xf32> -> vector<32x32xf32>
    %37 = arith.addf %30, %36 : vector<32x32xf32>
    %c4 = arith.constant 4 : index
    %c0_36 = arith.constant 0 : index
    %c0_37 = arith.constant 0 : index
    %38 = vector.load %arg3[%c4, %c0_36, %c0_37] : memref<9x32x128xf32, #tpu.memory_space<vmem>>, vector<1x32x128xf32>
    %39 = vector.shape_cast %38 : vector<1x32x128xf32> to vector<32x128xf32>
    %cst_38 = arith.constant dense<0.000000e+00> : vector<32x16xf32>
    %40 = tpu.matmul %39, %8, %cst_38 {dimension_numbers = #tpu.dot_dimension_numbers<[1], [0], [0], [1], [0, 0, 1, 1], [], []>} : vector<32x128xf32>, vector<128x16xf32>, vector<32x16xf32> -> vector<32x16xf32>
    %c4_39 = arith.constant 4 : index
    %c0_40 = arith.constant 0 : index
    %c0_41 = arith.constant 0 : index
    %41 = vector.load %arg4[%c4_39, %c0_40, %c0_41] : memref<9x16x32xf32, #tpu.memory_space<vmem>>, vector<1x16x32xf32>
    %42 = vector.shape_cast %41 : vector<1x16x32xf32> to vector<16x32xf32>
    %cst_42 = arith.constant dense<0.000000e+00> : vector<32x32xf32>
    %43 = tpu.matmul %40, %42, %cst_42 {dimension_numbers = #tpu.dot_dimension_numbers<[1], [0], [0], [1], [0, 0, 1, 1], [], []>} : vector<32x16xf32>, vector<16x32xf32>, vector<32x32xf32> -> vector<32x32xf32>
    %44 = arith.addf %37, %43 : vector<32x32xf32>
    %c5 = arith.constant 5 : index
    %c0_43 = arith.constant 0 : index
    %c0_44 = arith.constant 0 : index
    %45 = vector.load %arg3[%c5, %c0_43, %c0_44] : memref<9x32x128xf32, #tpu.memory_space<vmem>>, vector<1x32x128xf32>
    %46 = vector.shape_cast %45 : vector<1x32x128xf32> to vector<32x128xf32>
    %cst_45 = arith.constant dense<0.000000e+00> : vector<32x16xf32>
    %47 = tpu.matmul %46, %8, %cst_45 {dimension_numbers = #tpu.dot_dimension_numbers<[1], [0], [0], [1], [0, 0, 1, 1], [], []>} : vector<32x128xf32>, vector<128x16xf32>, vector<32x16xf32> -> vector<32x16xf32>
    %c5_46 = arith.constant 5 : index
    %c0_47 = arith.constant 0 : index
    %c0_48 = arith.constant 0 : index
    %48 = vector.load %arg4[%c5_46, %c0_47, %c0_48] : memref<9x16x32xf32, #tpu.memory_space<vmem>>, vector<1x16x32xf32>
    %49 = vector.shape_cast %48 : vector<1x16x32xf32> to vector<16x32xf32>
    %cst_49 = arith.constant dense<0.000000e+00> : vector<32x32xf32>
    %50 = tpu.matmul %47, %49, %cst_49 {dimension_numbers = #tpu.dot_dimension_numbers<[1], [0], [0], [1], [0, 0, 1, 1], [], []>} : vector<32x16xf32>, vector<16x32xf32>, vector<32x32xf32> -> vector<32x32xf32>
    %51 = arith.addf %44, %50 : vector<32x32xf32>
    %c6 = arith.constant 6 : index
    %c0_50 = arith.constant 0 : index
    %c0_51 = arith.constant 0 : index
    %52 = vector.load %arg3[%c6, %c0_50, %c0_51] : memref<9x32x128xf32, #tpu.memory_space<vmem>>, vector<1x32x128xf32>
    %53 = vector.shape_cast %52 : vector<1x32x128xf32> to vector<32x128xf32>
    %cst_52 = arith.constant dense<0.000000e+00> : vector<32x16xf32>
    %54 = tpu.matmul %53, %8, %cst_52 {dimension_numbers = #tpu.dot_dimension_numbers<[1], [0], [0], [1], [0, 0, 1, 1], [], []>} : vector<32x128xf32>, vector<128x16xf32>, vector<32x16xf32> -> vector<32x16xf32>
    %c6_53 = arith.constant 6 : index
    %c0_54 = arith.constant 0 : index
    %c0_55 = arith.constant 0 : index
    %55 = vector.load %arg4[%c6_53, %c0_54, %c0_55] : memref<9x16x32xf32, #tpu.memory_space<vmem>>, vector<1x16x32xf32>
    %56 = vector.shape_cast %55 : vector<1x16x32xf32> to vector<16x32xf32>
    %cst_56 = arith.constant dense<0.000000e+00> : vector<32x32xf32>
    %57 = tpu.matmul %54, %56, %cst_56 {dimension_numbers = #tpu.dot_dimension_numbers<[1], [0], [0], [1], [0, 0, 1, 1], [], []>} : vector<32x16xf32>, vector<16x32xf32>, vector<32x32xf32> -> vector<32x32xf32>
    %58 = arith.addf %51, %57 : vector<32x32xf32>
    %c7 = arith.constant 7 : index
    %c0_57 = arith.constant 0 : index
    %c0_58 = arith.constant 0 : index
    %59 = vector.load %arg3[%c7, %c0_57, %c0_58] : memref<9x32x128xf32, #tpu.memory_space<vmem>>, vector<1x32x128xf32>
    %60 = vector.shape_cast %59 : vector<1x32x128xf32> to vector<32x128xf32>
    %cst_59 = arith.constant dense<0.000000e+00> : vector<32x16xf32>
    %61 = tpu.matmul %60, %8, %cst_59 {dimension_numbers = #tpu.dot_dimension_numbers<[1], [0], [0], [1], [0, 0, 1, 1], [], []>} : vector<32x128xf32>, vector<128x16xf32>, vector<32x16xf32> -> vector<32x16xf32>
    %c7_60 = arith.constant 7 : index
    %c0_61 = arith.constant 0 : index
    %c0_62 = arith.constant 0 : index
    %62 = vector.load %arg4[%c7_60, %c0_61, %c0_62] : memref<9x16x32xf32, #tpu.memory_space<vmem>>, vector<1x16x32xf32>
    %63 = vector.shape_cast %62 : vector<1x16x32xf32> to vector<16x32xf32>
    %cst_63 = arith.constant dense<0.000000e+00> : vector<32x32xf32>
    %64 = tpu.matmul %61, %63, %cst_63 {dimension_numbers = #tpu.dot_dimension_numbers<[1], [0], [0], [1], [0, 0, 1, 1], [], []>} : vector<32x16xf32>, vector<16x32xf32>, vector<32x32xf32> -> vector<32x32xf32>
    %65 = arith.addf %58, %64 : vector<32x32xf32>
    %c8 = arith.constant 8 : index
    %c0_64 = arith.constant 0 : index
    %c0_65 = arith.constant 0 : index
    %66 = vector.load %arg3[%c8, %c0_64, %c0_65] : memref<9x32x128xf32, #tpu.memory_space<vmem>>, vector<1x32x128xf32>
    %67 = vector.shape_cast %66 : vector<1x32x128xf32> to vector<32x128xf32>
    %cst_66 = arith.constant dense<0.000000e+00> : vector<32x16xf32>
    %68 = tpu.matmul %67, %8, %cst_66 {dimension_numbers = #tpu.dot_dimension_numbers<[1], [0], [0], [1], [0, 0, 1, 1], [], []>} : vector<32x128xf32>, vector<128x16xf32>, vector<32x16xf32> -> vector<32x16xf32>
    %c8_67 = arith.constant 8 : index
    %c0_68 = arith.constant 0 : index
    %c0_69 = arith.constant 0 : index
    %69 = vector.load %arg4[%c8_67, %c0_68, %c0_69] : memref<9x16x32xf32, #tpu.memory_space<vmem>>, vector<1x16x32xf32>
    %70 = vector.shape_cast %69 : vector<1x16x32xf32> to vector<16x32xf32>
    %cst_70 = arith.constant dense<0.000000e+00> : vector<32x32xf32>
    %71 = tpu.matmul %68, %70, %cst_70 {dimension_numbers = #tpu.dot_dimension_numbers<[1], [0], [0], [1], [0, 0, 1, 1], [], []>} : vector<32x16xf32>, vector<16x32xf32>, vector<32x32xf32> -> vector<32x32xf32>
    %72 = arith.addf %65, %71 : vector<32x32xf32>
    %c0_71 = arith.constant 0 : index
    %c0_72 = arith.constant 0 : index
    %73 = vector.load %arg5[%c0_71, %c0_72] : memref<3x32xf32, #tpu.memory_space<vmem>>, vector<1x32xf32>
    %74 = vector.broadcast %73 : vector<1x32xf32> to vector<32x32xf32>
    %75 = arith.addf %72, %74 : vector<32x32xf32>
    %cst_73 = arith.constant 2.000000e-01 : f32
    %76 = vector.broadcast %cst_73 : f32 to vector<32x32xf32>
    %77 = arith.mulf %76, %75 : vector<32x32xf32>
    %78 = arith.maximumf %75, %77 : vector<32x32xf32>
    %c1_74 = arith.constant 1 : index
    %c0_75 = arith.constant 0 : index
    %79 = vector.load %arg5[%c1_74, %c0_75] : memref<3x32xf32, #tpu.memory_space<vmem>>, vector<1x32xf32>
    %80 = vector.broadcast %79 : vector<1x32xf32> to vector<32x32xf32>
    %81 = arith.mulf %78, %80 : vector<32x32xf32>
    %c2_76 = arith.constant 2 : index
    %c0_77 = arith.constant 0 : index
    %82 = vector.load %arg5[%c2_76, %c0_77] : memref<3x32xf32, #tpu.memory_space<vmem>>, vector<1x32xf32>
    %83 = vector.broadcast %82 : vector<1x32xf32> to vector<32x32xf32>
    %84 = arith.addf %81, %83 : vector<32x32xf32>
    %cst_78 = arith.constant 0.000000e+00 : f32
    %85 = vector.broadcast %cst_78 : f32 to vector<8x64xf32>
    %c0_79 = arith.constant 0 : index
    %c0_80 = arith.constant 0 : index
    %c0_81 = arith.constant 0 : index
    %86 = vector.load %arg6[%c0_79, %c0_80, %c0_81] : memref<9x8x32xf32, #tpu.memory_space<vmem>>, vector<1x8x32xf32>
    %87 = vector.shape_cast %86 : vector<1x8x32xf32> to vector<8x32xf32>
    %cst_82 = arith.constant dense<0.000000e+00> : vector<8x32xf32>
    %88 = tpu.matmul %87, %84, %cst_82 {dimension_numbers = #tpu.dot_dimension_numbers<[1], [0], [0], [1], [0, 0, 1, 1], [], []>} : vector<8x32xf32>, vector<32x32xf32>, vector<8x32xf32> -> vector<8x32xf32>
    %c0_83 = arith.constant 0 : index
    %c0_84 = arith.constant 0 : index
    %c0_85 = arith.constant 0 : index
    %89 = vector.load %arg7[%c0_83, %c0_84, %c0_85] : memref<9x32x64xf32, #tpu.memory_space<vmem>>, vector<1x32x64xf32>
    %90 = vector.shape_cast %89 : vector<1x32x64xf32> to vector<32x64xf32>
    %cst_86 = arith.constant dense<0.000000e+00> : vector<8x64xf32>
    %91 = tpu.matmul %88, %90, %cst_86 {dimension_numbers = #tpu.dot_dimension_numbers<[1], [0], [0], [1], [0, 0, 1, 1], [], []>} : vector<8x32xf32>, vector<32x64xf32>, vector<8x64xf32> -> vector<8x64xf32>
    %92 = arith.addf %85, %91 : vector<8x64xf32>
    %c1_87 = arith.constant 1 : index
    %c0_88 = arith.constant 0 : index
    %c0_89 = arith.constant 0 : index
    %93 = vector.load %arg6[%c1_87, %c0_88, %c0_89] : memref<9x8x32xf32, #tpu.memory_space<vmem>>, vector<1x8x32xf32>
    %94 = vector.shape_cast %93 : vector<1x8x32xf32> to vector<8x32xf32>
    %cst_90 = arith.constant dense<0.000000e+00> : vector<8x32xf32>
    %95 = tpu.matmul %94, %84, %cst_90 {dimension_numbers = #tpu.dot_dimension_numbers<[1], [0], [0], [1], [0, 0, 1, 1], [], []>} : vector<8x32xf32>, vector<32x32xf32>, vector<8x32xf32> -> vector<8x32xf32>
    %c1_91 = arith.constant 1 : index
    %c0_92 = arith.constant 0 : index
    %c0_93 = arith.constant 0 : index
    %96 = vector.load %arg7[%c1_91, %c0_92, %c0_93] : memref<9x32x64xf32, #tpu.memory_space<vmem>>, vector<1x32x64xf32>
    %97 = vector.shape_cast %96 : vector<1x32x64xf32> to vector<32x64xf32>
    %cst_94 = arith.constant dense<0.000000e+00> : vector<8x64xf32>
    %98 = tpu.matmul %95, %97, %cst_94 {dimension_numbers = #tpu.dot_dimension_numbers<[1], [0], [0], [1], [0, 0, 1, 1], [], []>} : vector<8x32xf32>, vector<32x64xf32>, vector<8x64xf32> -> vector<8x64xf32>
    %99 = arith.addf %92, %98 : vector<8x64xf32>
    %c2_95 = arith.constant 2 : index
    %c0_96 = arith.constant 0 : index
    %c0_97 = arith.constant 0 : index
    %100 = vector.load %arg6[%c2_95, %c0_96, %c0_97] : memref<9x8x32xf32, #tpu.memory_space<vmem>>, vector<1x8x32xf32>
    %101 = vector.shape_cast %100 : vector<1x8x32xf32> to vector<8x32xf32>
    %cst_98 = arith.constant dense<0.000000e+00> : vector<8x32xf32>
    %102 = tpu.matmul %101, %84, %cst_98 {dimension_numbers = #tpu.dot_dimension_numbers<[1], [0], [0], [1], [0, 0, 1, 1], [], []>} : vector<8x32xf32>, vector<32x32xf32>, vector<8x32xf32> -> vector<8x32xf32>
    %c2_99 = arith.constant 2 : index
    %c0_100 = arith.constant 0 : index
    %c0_101 = arith.constant 0 : index
    %103 = vector.load %arg7[%c2_99, %c0_100, %c0_101] : memref<9x32x64xf32, #tpu.memory_space<vmem>>, vector<1x32x64xf32>
    %104 = vector.shape_cast %103 : vector<1x32x64xf32> to vector<32x64xf32>
    %cst_102 = arith.constant dense<0.000000e+00> : vector<8x64xf32>
    %105 = tpu.matmul %102, %104, %cst_102 {dimension_numbers = #tpu.dot_dimension_numbers<[1], [0], [0], [1], [0, 0, 1, 1], [], []>} : vector<8x32xf32>, vector<32x64xf32>, vector<8x64xf32> -> vector<8x64xf32>
    %106 = arith.addf %99, %105 : vector<8x64xf32>
    %c3_103 = arith.constant 3 : index
    %c0_104 = arith.constant 0 : index
    %c0_105 = arith.constant 0 : index
    %107 = vector.load %arg6[%c3_103, %c0_104, %c0_105] : memref<9x8x32xf32, #tpu.memory_space<vmem>>, vector<1x8x32xf32>
    %108 = vector.shape_cast %107 : vector<1x8x32xf32> to vector<8x32xf32>
    %cst_106 = arith.constant dense<0.000000e+00> : vector<8x32xf32>
    %109 = tpu.matmul %108, %84, %cst_106 {dimension_numbers = #tpu.dot_dimension_numbers<[1], [0], [0], [1], [0, 0, 1, 1], [], []>} : vector<8x32xf32>, vector<32x32xf32>, vector<8x32xf32> -> vector<8x32xf32>
    %c3_107 = arith.constant 3 : index
    %c0_108 = arith.constant 0 : index
    %c0_109 = arith.constant 0 : index
    %110 = vector.load %arg7[%c3_107, %c0_108, %c0_109] : memref<9x32x64xf32, #tpu.memory_space<vmem>>, vector<1x32x64xf32>
    %111 = vector.shape_cast %110 : vector<1x32x64xf32> to vector<32x64xf32>
    %cst_110 = arith.constant dense<0.000000e+00> : vector<8x64xf32>
    %112 = tpu.matmul %109, %111, %cst_110 {dimension_numbers = #tpu.dot_dimension_numbers<[1], [0], [0], [1], [0, 0, 1, 1], [], []>} : vector<8x32xf32>, vector<32x64xf32>, vector<8x64xf32> -> vector<8x64xf32>
    %113 = arith.addf %106, %112 : vector<8x64xf32>
    %c4_111 = arith.constant 4 : index
    %c0_112 = arith.constant 0 : index
    %c0_113 = arith.constant 0 : index
    %114 = vector.load %arg6[%c4_111, %c0_112, %c0_113] : memref<9x8x32xf32, #tpu.memory_space<vmem>>, vector<1x8x32xf32>
    %115 = vector.shape_cast %114 : vector<1x8x32xf32> to vector<8x32xf32>
    %cst_114 = arith.constant dense<0.000000e+00> : vector<8x32xf32>
    %116 = tpu.matmul %115, %84, %cst_114 {dimension_numbers = #tpu.dot_dimension_numbers<[1], [0], [0], [1], [0, 0, 1, 1], [], []>} : vector<8x32xf32>, vector<32x32xf32>, vector<8x32xf32> -> vector<8x32xf32>
    %c4_115 = arith.constant 4 : index
    %c0_116 = arith.constant 0 : index
    %c0_117 = arith.constant 0 : index
    %117 = vector.load %arg7[%c4_115, %c0_116, %c0_117] : memref<9x32x64xf32, #tpu.memory_space<vmem>>, vector<1x32x64xf32>
    %118 = vector.shape_cast %117 : vector<1x32x64xf32> to vector<32x64xf32>
    %cst_118 = arith.constant dense<0.000000e+00> : vector<8x64xf32>
    %119 = tpu.matmul %116, %118, %cst_118 {dimension_numbers = #tpu.dot_dimension_numbers<[1], [0], [0], [1], [0, 0, 1, 1], [], []>} : vector<8x32xf32>, vector<32x64xf32>, vector<8x64xf32> -> vector<8x64xf32>
    %120 = arith.addf %113, %119 : vector<8x64xf32>
    %c5_119 = arith.constant 5 : index
    %c0_120 = arith.constant 0 : index
    %c0_121 = arith.constant 0 : index
    %121 = vector.load %arg6[%c5_119, %c0_120, %c0_121] : memref<9x8x32xf32, #tpu.memory_space<vmem>>, vector<1x8x32xf32>
    %122 = vector.shape_cast %121 : vector<1x8x32xf32> to vector<8x32xf32>
    %cst_122 = arith.constant dense<0.000000e+00> : vector<8x32xf32>
    %123 = tpu.matmul %122, %84, %cst_122 {dimension_numbers = #tpu.dot_dimension_numbers<[1], [0], [0], [1], [0, 0, 1, 1], [], []>} : vector<8x32xf32>, vector<32x32xf32>, vector<8x32xf32> -> vector<8x32xf32>
    %c5_123 = arith.constant 5 : index
    %c0_124 = arith.constant 0 : index
    %c0_125 = arith.constant 0 : index
    %124 = vector.load %arg7[%c5_123, %c0_124, %c0_125] : memref<9x32x64xf32, #tpu.memory_space<vmem>>, vector<1x32x64xf32>
    %125 = vector.shape_cast %124 : vector<1x32x64xf32> to vector<32x64xf32>
    %cst_126 = arith.constant dense<0.000000e+00> : vector<8x64xf32>
    %126 = tpu.matmul %123, %125, %cst_126 {dimension_numbers = #tpu.dot_dimension_numbers<[1], [0], [0], [1], [0, 0, 1, 1], [], []>} : vector<8x32xf32>, vector<32x64xf32>, vector<8x64xf32> -> vector<8x64xf32>
    %127 = arith.addf %120, %126 : vector<8x64xf32>
    %c6_127 = arith.constant 6 : index
    %c0_128 = arith.constant 0 : index
    %c0_129 = arith.constant 0 : index
    %128 = vector.load %arg6[%c6_127, %c0_128, %c0_129] : memref<9x8x32xf32, #tpu.memory_space<vmem>>, vector<1x8x32xf32>
    %129 = vector.shape_cast %128 : vector<1x8x32xf32> to vector<8x32xf32>
    %cst_130 = arith.constant dense<0.000000e+00> : vector<8x32xf32>
    %130 = tpu.matmul %129, %84, %cst_130 {dimension_numbers = #tpu.dot_dimension_numbers<[1], [0], [0], [1], [0, 0, 1, 1], [], []>} : vector<8x32xf32>, vector<32x32xf32>, vector<8x32xf32> -> vector<8x32xf32>
    %c6_131 = arith.constant 6 : index
    %c0_132 = arith.constant 0 : index
    %c0_133 = arith.constant 0 : index
    %131 = vector.load %arg7[%c6_131, %c0_132, %c0_133] : memref<9x32x64xf32, #tpu.memory_space<vmem>>, vector<1x32x64xf32>
    %132 = vector.shape_cast %131 : vector<1x32x64xf32> to vector<32x64xf32>
    %cst_134 = arith.constant dense<0.000000e+00> : vector<8x64xf32>
    %133 = tpu.matmul %130, %132, %cst_134 {dimension_numbers = #tpu.dot_dimension_numbers<[1], [0], [0], [1], [0, 0, 1, 1], [], []>} : vector<8x32xf32>, vector<32x64xf32>, vector<8x64xf32> -> vector<8x64xf32>
    %134 = arith.addf %127, %133 : vector<8x64xf32>
    %c7_135 = arith.constant 7 : index
    %c0_136 = arith.constant 0 : index
    %c0_137 = arith.constant 0 : index
    %135 = vector.load %arg6[%c7_135, %c0_136, %c0_137] : memref<9x8x32xf32, #tpu.memory_space<vmem>>, vector<1x8x32xf32>
    %136 = vector.shape_cast %135 : vector<1x8x32xf32> to vector<8x32xf32>
    %cst_138 = arith.constant dense<0.000000e+00> : vector<8x32xf32>
    %137 = tpu.matmul %136, %84, %cst_138 {dimension_numbers = #tpu.dot_dimension_numbers<[1], [0], [0], [1], [0, 0, 1, 1], [], []>} : vector<8x32xf32>, vector<32x32xf32>, vector<8x32xf32> -> vector<8x32xf32>
    %c7_139 = arith.constant 7 : index
    %c0_140 = arith.constant 0 : index
    %c0_141 = arith.constant 0 : index
    %138 = vector.load %arg7[%c7_139, %c0_140, %c0_141] : memref<9x32x64xf32, #tpu.memory_space<vmem>>, vector<1x32x64xf32>
    %139 = vector.shape_cast %138 : vector<1x32x64xf32> to vector<32x64xf32>
    %cst_142 = arith.constant dense<0.000000e+00> : vector<8x64xf32>
    %140 = tpu.matmul %137, %139, %cst_142 {dimension_numbers = #tpu.dot_dimension_numbers<[1], [0], [0], [1], [0, 0, 1, 1], [], []>} : vector<8x32xf32>, vector<32x64xf32>, vector<8x64xf32> -> vector<8x64xf32>
    %141 = arith.addf %134, %140 : vector<8x64xf32>
    %c8_143 = arith.constant 8 : index
    %c0_144 = arith.constant 0 : index
    %c0_145 = arith.constant 0 : index
    %142 = vector.load %arg6[%c8_143, %c0_144, %c0_145] : memref<9x8x32xf32, #tpu.memory_space<vmem>>, vector<1x8x32xf32>
    %143 = vector.shape_cast %142 : vector<1x8x32xf32> to vector<8x32xf32>
    %cst_146 = arith.constant dense<0.000000e+00> : vector<8x32xf32>
    %144 = tpu.matmul %143, %84, %cst_146 {dimension_numbers = #tpu.dot_dimension_numbers<[1], [0], [0], [1], [0, 0, 1, 1], [], []>} : vector<8x32xf32>, vector<32x32xf32>, vector<8x32xf32> -> vector<8x32xf32>
    %c8_147 = arith.constant 8 : index
    %c0_148 = arith.constant 0 : index
    %c0_149 = arith.constant 0 : index
    %145 = vector.load %arg7[%c8_147, %c0_148, %c0_149] : memref<9x32x64xf32, #tpu.memory_space<vmem>>, vector<1x32x64xf32>
    %146 = vector.shape_cast %145 : vector<1x32x64xf32> to vector<32x64xf32>
    %cst_150 = arith.constant dense<0.000000e+00> : vector<8x64xf32>
    %147 = tpu.matmul %144, %146, %cst_150 {dimension_numbers = #tpu.dot_dimension_numbers<[1], [0], [0], [1], [0, 0, 1, 1], [], []>} : vector<8x32xf32>, vector<32x64xf32>, vector<8x64xf32> -> vector<8x64xf32>
    %148 = arith.addf %141, %147 : vector<8x64xf32>
    %c0_151 = arith.constant 0 : index
    %c0_152 = arith.constant 0 : index
    %149 = vector.load %arg8[%c0_151, %c0_152] : memref<3x64xf32, #tpu.memory_space<vmem>>, vector<1x64xf32>
    %150 = vector.broadcast %149 : vector<1x64xf32> to vector<8x64xf32>
    %151 = arith.addf %148, %150 : vector<8x64xf32>
    %cst_153 = arith.constant 2.000000e-01 : f32
    %152 = vector.broadcast %cst_153 : f32 to vector<8x64xf32>
    %153 = arith.mulf %152, %151 : vector<8x64xf32>
    %154 = arith.maximumf %151, %153 : vector<8x64xf32>
    %c1_154 = arith.constant 1 : index
    %c0_155 = arith.constant 0 : index
    %155 = vector.load %arg8[%c1_154, %c0_155] : memref<3x64xf32, #tpu.memory_space<vmem>>, vector<1x64xf32>
    %156 = vector.broadcast %155 : vector<1x64xf32> to vector<8x64xf32>
    %157 = arith.mulf %154, %156 : vector<8x64xf32>
    %c2_156 = arith.constant 2 : index
    %c0_157 = arith.constant 0 : index
    %158 = vector.load %arg8[%c2_156, %c0_157] : memref<3x64xf32, #tpu.memory_space<vmem>>, vector<1x64xf32>
    %159 = vector.broadcast %158 : vector<1x64xf32> to vector<8x64xf32>
    %160 = arith.addf %157, %159 : vector<8x64xf32>
    %cst_158 = arith.constant 0.000000e+00 : f32
    %161 = vector.broadcast %cst_158 : f32 to vector<2x128xf32>
    %c0_159 = arith.constant 0 : index
    %c0_160 = arith.constant 0 : index
    %c0_161 = arith.constant 0 : index
    %162 = vector.load %arg9[%c0_159, %c0_160, %c0_161] : memref<9x2x8xf32, #tpu.memory_space<vmem>>, vector<1x2x8xf32>
    %163 = vector.shape_cast %162 : vector<1x2x8xf32> to vector<2x8xf32>
    %cst_162 = arith.constant dense<0.000000e+00> : vector<2x64xf32>
    %164 = tpu.matmul %163, %160, %cst_162 {dimension_numbers = #tpu.dot_dimension_numbers<[1], [0], [0], [1], [0, 0, 1, 1], [], []>} : vector<2x8xf32>, vector<8x64xf32>, vector<2x64xf32> -> vector<2x64xf32>
    %c0_163 = arith.constant 0 : index
    %c0_164 = arith.constant 0 : index
    %c0_165 = arith.constant 0 : index
    %165 = vector.load %arg10[%c0_163, %c0_164, %c0_165] : memref<9x64x128xf32, #tpu.memory_space<vmem>>, vector<1x64x128xf32>
    %166 = vector.shape_cast %165 : vector<1x64x128xf32> to vector<64x128xf32>
    %cst_166 = arith.constant dense<0.000000e+00> : vector<2x128xf32>
    %167 = tpu.matmul %164, %166, %cst_166 {dimension_numbers = #tpu.dot_dimension_numbers<[1], [0], [0], [1], [0, 0, 1, 1], [], []>} : vector<2x64xf32>, vector<64x128xf32>, vector<2x128xf32> -> vector<2x128xf32>
    %168 = arith.addf %161, %167 : vector<2x128xf32>
    %c1_167 = arith.constant 1 : index
    %c0_168 = arith.constant 0 : index
    %c0_169 = arith.constant 0 : index
    %169 = vector.load %arg9[%c1_167, %c0_168, %c0_169] : memref<9x2x8xf32, #tpu.memory_space<vmem>>, vector<1x2x8xf32>
    %170 = vector.shape_cast %169 : vector<1x2x8xf32> to vector<2x8xf32>
    %cst_170 = arith.constant dense<0.000000e+00> : vector<2x64xf32>
    %171 = tpu.matmul %170, %160, %cst_170 {dimension_numbers = #tpu.dot_dimension_numbers<[1], [0], [0], [1], [0, 0, 1, 1], [], []>} : vector<2x8xf32>, vector<8x64xf32>, vector<2x64xf32> -> vector<2x64xf32>
    %c1_171 = arith.constant 1 : index
    %c0_172 = arith.constant 0 : index
    %c0_173 = arith.constant 0 : index
    %172 = vector.load %arg10[%c1_171, %c0_172, %c0_173] : memref<9x64x128xf32, #tpu.memory_space<vmem>>, vector<1x64x128xf32>
    %173 = vector.shape_cast %172 : vector<1x64x128xf32> to vector<64x128xf32>
    %cst_174 = arith.constant dense<0.000000e+00> : vector<2x128xf32>
    %174 = tpu.matmul %171, %173, %cst_174 {dimension_numbers = #tpu.dot_dimension_numbers<[1], [0], [0], [1], [0, 0, 1, 1], [], []>} : vector<2x64xf32>, vector<64x128xf32>, vector<2x128xf32> -> vector<2x128xf32>
    %175 = arith.addf %168, %174 : vector<2x128xf32>
    %c2_175 = arith.constant 2 : index
    %c0_176 = arith.constant 0 : index
    %c0_177 = arith.constant 0 : index
    %176 = vector.load %arg9[%c2_175, %c0_176, %c0_177] : memref<9x2x8xf32, #tpu.memory_space<vmem>>, vector<1x2x8xf32>
    %177 = vector.shape_cast %176 : vector<1x2x8xf32> to vector<2x8xf32>
    %cst_178 = arith.constant dense<0.000000e+00> : vector<2x64xf32>
    %178 = tpu.matmul %177, %160, %cst_178 {dimension_numbers = #tpu.dot_dimension_numbers<[1], [0], [0], [1], [0, 0, 1, 1], [], []>} : vector<2x8xf32>, vector<8x64xf32>, vector<2x64xf32> -> vector<2x64xf32>
    %c2_179 = arith.constant 2 : index
    %c0_180 = arith.constant 0 : index
    %c0_181 = arith.constant 0 : index
    %179 = vector.load %arg10[%c2_179, %c0_180, %c0_181] : memref<9x64x128xf32, #tpu.memory_space<vmem>>, vector<1x64x128xf32>
    %180 = vector.shape_cast %179 : vector<1x64x128xf32> to vector<64x128xf32>
    %cst_182 = arith.constant dense<0.000000e+00> : vector<2x128xf32>
    %181 = tpu.matmul %178, %180, %cst_182 {dimension_numbers = #tpu.dot_dimension_numbers<[1], [0], [0], [1], [0, 0, 1, 1], [], []>} : vector<2x64xf32>, vector<64x128xf32>, vector<2x128xf32> -> vector<2x128xf32>
    %182 = arith.addf %175, %181 : vector<2x128xf32>
    %c3_183 = arith.constant 3 : index
    %c0_184 = arith.constant 0 : index
    %c0_185 = arith.constant 0 : index
    %183 = vector.load %arg9[%c3_183, %c0_184, %c0_185] : memref<9x2x8xf32, #tpu.memory_space<vmem>>, vector<1x2x8xf32>
    %184 = vector.shape_cast %183 : vector<1x2x8xf32> to vector<2x8xf32>
    %cst_186 = arith.constant dense<0.000000e+00> : vector<2x64xf32>
    %185 = tpu.matmul %184, %160, %cst_186 {dimension_numbers = #tpu.dot_dimension_numbers<[1], [0], [0], [1], [0, 0, 1, 1], [], []>} : vector<2x8xf32>, vector<8x64xf32>, vector<2x64xf32> -> vector<2x64xf32>
    %c3_187 = arith.constant 3 : index
    %c0_188 = arith.constant 0 : index
    %c0_189 = arith.constant 0 : index
    %186 = vector.load %arg10[%c3_187, %c0_188, %c0_189] : memref<9x64x128xf32, #tpu.memory_space<vmem>>, vector<1x64x128xf32>
    %187 = vector.shape_cast %186 : vector<1x64x128xf32> to vector<64x128xf32>
    %cst_190 = arith.constant dense<0.000000e+00> : vector<2x128xf32>
    %188 = tpu.matmul %185, %187, %cst_190 {dimension_numbers = #tpu.dot_dimension_numbers<[1], [0], [0], [1], [0, 0, 1, 1], [], []>} : vector<2x64xf32>, vector<64x128xf32>, vector<2x128xf32> -> vector<2x128xf32>
    %189 = arith.addf %182, %188 : vector<2x128xf32>
    %c4_191 = arith.constant 4 : index
    %c0_192 = arith.constant 0 : index
    %c0_193 = arith.constant 0 : index
    %190 = vector.load %arg9[%c4_191, %c0_192, %c0_193] : memref<9x2x8xf32, #tpu.memory_space<vmem>>, vector<1x2x8xf32>
    %191 = vector.shape_cast %190 : vector<1x2x8xf32> to vector<2x8xf32>
    %cst_194 = arith.constant dense<0.000000e+00> : vector<2x64xf32>
    %192 = tpu.matmul %191, %160, %cst_194 {dimension_numbers = #tpu.dot_dimension_numbers<[1], [0], [0], [1], [0, 0, 1, 1], [], []>} : vector<2x8xf32>, vector<8x64xf32>, vector<2x64xf32> -> vector<2x64xf32>
    %c4_195 = arith.constant 4 : index
    %c0_196 = arith.constant 0 : index
    %c0_197 = arith.constant 0 : index
    %193 = vector.load %arg10[%c4_195, %c0_196, %c0_197] : memref<9x64x128xf32, #tpu.memory_space<vmem>>, vector<1x64x128xf32>
    %194 = vector.shape_cast %193 : vector<1x64x128xf32> to vector<64x128xf32>
    %cst_198 = arith.constant dense<0.000000e+00> : vector<2x128xf32>
    %195 = tpu.matmul %192, %194, %cst_198 {dimension_numbers = #tpu.dot_dimension_numbers<[1], [0], [0], [1], [0, 0, 1, 1], [], []>} : vector<2x64xf32>, vector<64x128xf32>, vector<2x128xf32> -> vector<2x128xf32>
    %196 = arith.addf %189, %195 : vector<2x128xf32>
    %c5_199 = arith.constant 5 : index
    %c0_200 = arith.constant 0 : index
    %c0_201 = arith.constant 0 : index
    %197 = vector.load %arg9[%c5_199, %c0_200, %c0_201] : memref<9x2x8xf32, #tpu.memory_space<vmem>>, vector<1x2x8xf32>
    %198 = vector.shape_cast %197 : vector<1x2x8xf32> to vector<2x8xf32>
    %cst_202 = arith.constant dense<0.000000e+00> : vector<2x64xf32>
    %199 = tpu.matmul %198, %160, %cst_202 {dimension_numbers = #tpu.dot_dimension_numbers<[1], [0], [0], [1], [0, 0, 1, 1], [], []>} : vector<2x8xf32>, vector<8x64xf32>, vector<2x64xf32> -> vector<2x64xf32>
    %c5_203 = arith.constant 5 : index
    %c0_204 = arith.constant 0 : index
    %c0_205 = arith.constant 0 : index
    %200 = vector.load %arg10[%c5_203, %c0_204, %c0_205] : memref<9x64x128xf32, #tpu.memory_space<vmem>>, vector<1x64x128xf32>
    %201 = vector.shape_cast %200 : vector<1x64x128xf32> to vector<64x128xf32>
    %cst_206 = arith.constant dense<0.000000e+00> : vector<2x128xf32>
    %202 = tpu.matmul %199, %201, %cst_206 {dimension_numbers = #tpu.dot_dimension_numbers<[1], [0], [0], [1], [0, 0, 1, 1], [], []>} : vector<2x64xf32>, vector<64x128xf32>, vector<2x128xf32> -> vector<2x128xf32>
    %203 = arith.addf %196, %202 : vector<2x128xf32>
    %c6_207 = arith.constant 6 : index
    %c0_208 = arith.constant 0 : index
    %c0_209 = arith.constant 0 : index
    %204 = vector.load %arg9[%c6_207, %c0_208, %c0_209] : memref<9x2x8xf32, #tpu.memory_space<vmem>>, vector<1x2x8xf32>
    %205 = vector.shape_cast %204 : vector<1x2x8xf32> to vector<2x8xf32>
    %cst_210 = arith.constant dense<0.000000e+00> : vector<2x64xf32>
    %206 = tpu.matmul %205, %160, %cst_210 {dimension_numbers = #tpu.dot_dimension_numbers<[1], [0], [0], [1], [0, 0, 1, 1], [], []>} : vector<2x8xf32>, vector<8x64xf32>, vector<2x64xf32> -> vector<2x64xf32>
    %c6_211 = arith.constant 6 : index
    %c0_212 = arith.constant 0 : index
    %c0_213 = arith.constant 0 : index
    %207 = vector.load %arg10[%c6_211, %c0_212, %c0_213] : memref<9x64x128xf32, #tpu.memory_space<vmem>>, vector<1x64x128xf32>
    %208 = vector.shape_cast %207 : vector<1x64x128xf32> to vector<64x128xf32>
    %cst_214 = arith.constant dense<0.000000e+00> : vector<2x128xf32>
    %209 = tpu.matmul %206, %208, %cst_214 {dimension_numbers = #tpu.dot_dimension_numbers<[1], [0], [0], [1], [0, 0, 1, 1], [], []>} : vector<2x64xf32>, vector<64x128xf32>, vector<2x128xf32> -> vector<2x128xf32>
    %210 = arith.addf %203, %209 : vector<2x128xf32>
    %c7_215 = arith.constant 7 : index
    %c0_216 = arith.constant 0 : index
    %c0_217 = arith.constant 0 : index
    %211 = vector.load %arg9[%c7_215, %c0_216, %c0_217] : memref<9x2x8xf32, #tpu.memory_space<vmem>>, vector<1x2x8xf32>
    %212 = vector.shape_cast %211 : vector<1x2x8xf32> to vector<2x8xf32>
    %cst_218 = arith.constant dense<0.000000e+00> : vector<2x64xf32>
    %213 = tpu.matmul %212, %160, %cst_218 {dimension_numbers = #tpu.dot_dimension_numbers<[1], [0], [0], [1], [0, 0, 1, 1], [], []>} : vector<2x8xf32>, vector<8x64xf32>, vector<2x64xf32> -> vector<2x64xf32>
    %c7_219 = arith.constant 7 : index
    %c0_220 = arith.constant 0 : index
    %c0_221 = arith.constant 0 : index
    %214 = vector.load %arg10[%c7_219, %c0_220, %c0_221] : memref<9x64x128xf32, #tpu.memory_space<vmem>>, vector<1x64x128xf32>
    %215 = vector.shape_cast %214 : vector<1x64x128xf32> to vector<64x128xf32>
    %cst_222 = arith.constant dense<0.000000e+00> : vector<2x128xf32>
    %216 = tpu.matmul %213, %215, %cst_222 {dimension_numbers = #tpu.dot_dimension_numbers<[1], [0], [0], [1], [0, 0, 1, 1], [], []>} : vector<2x64xf32>, vector<64x128xf32>, vector<2x128xf32> -> vector<2x128xf32>
    %217 = arith.addf %210, %216 : vector<2x128xf32>
    %c8_223 = arith.constant 8 : index
    %c0_224 = arith.constant 0 : index
    %c0_225 = arith.constant 0 : index
    %218 = vector.load %arg9[%c8_223, %c0_224, %c0_225] : memref<9x2x8xf32, #tpu.memory_space<vmem>>, vector<1x2x8xf32>
    %219 = vector.shape_cast %218 : vector<1x2x8xf32> to vector<2x8xf32>
    %cst_226 = arith.constant dense<0.000000e+00> : vector<2x64xf32>
    %220 = tpu.matmul %219, %160, %cst_226 {dimension_numbers = #tpu.dot_dimension_numbers<[1], [0], [0], [1], [0, 0, 1, 1], [], []>} : vector<2x8xf32>, vector<8x64xf32>, vector<2x64xf32> -> vector<2x64xf32>
    %c8_227 = arith.constant 8 : index
    %c0_228 = arith.constant 0 : index
    %c0_229 = arith.constant 0 : index
    %221 = vector.load %arg10[%c8_227, %c0_228, %c0_229] : memref<9x64x128xf32, #tpu.memory_space<vmem>>, vector<1x64x128xf32>
    %222 = vector.shape_cast %221 : vector<1x64x128xf32> to vector<64x128xf32>
    %cst_230 = arith.constant dense<0.000000e+00> : vector<2x128xf32>
    %223 = tpu.matmul %220, %222, %cst_230 {dimension_numbers = #tpu.dot_dimension_numbers<[1], [0], [0], [1], [0, 0, 1, 1], [], []>} : vector<2x64xf32>, vector<64x128xf32>, vector<2x128xf32> -> vector<2x128xf32>
    %224 = arith.addf %217, %223 : vector<2x128xf32>
    %c0_231 = arith.constant 0 : index
    %c0_232 = arith.constant 0 : index
    %225 = vector.load %arg11[%c0_231, %c0_232] : memref<3x128xf32, #tpu.memory_space<vmem>>, vector<1x128xf32>
    %226 = vector.broadcast %225 : vector<1x128xf32> to vector<2x128xf32>
    %227 = arith.addf %224, %226 : vector<2x128xf32>
    %cst_233 = arith.constant 2.000000e-01 : f32
    %228 = vector.broadcast %cst_233 : f32 to vector<2x128xf32>
    %229 = arith.mulf %228, %227 : vector<2x128xf32>
    %230 = arith.maximumf %227, %229 : vector<2x128xf32>
    %c1_234 = arith.constant 1 : index
    %c0_235 = arith.constant 0 : index
    %231 = vector.load %arg11[%c1_234, %c0_235] : memref<3x128xf32, #tpu.memory_space<vmem>>, vector<1x128xf32>
    %232 = vector.broadcast %231 : vector<1x128xf32> to vector<2x128xf32>
    %233 = arith.mulf %230, %232 : vector<2x128xf32>
    %c2_236 = arith.constant 2 : index
    %c0_237 = arith.constant 0 : index
    %234 = vector.load %arg11[%c2_236, %c0_237] : memref<3x128xf32, #tpu.memory_space<vmem>>, vector<1x128xf32>
    %235 = vector.broadcast %234 : vector<1x128xf32> to vector<2x128xf32>
    %236 = arith.addf %233, %235 : vector<2x128xf32>
    %c0_238 = arith.constant 0 : index
    %c0_239 = arith.constant 0 : index
    %237 = vector.load %arg12[%c0_238, %c0_239] : memref<128x1xf32, #tpu.memory_space<vmem>>, vector<128x1xf32>
    %cst_240 = arith.constant dense<0.000000e+00> : vector<2x1xf32>
    %238 = tpu.matmul %236, %237, %cst_240 {dimension_numbers = #tpu.dot_dimension_numbers<[1], [0], [0], [1], [0, 0, 1, 1], [], []>} : vector<2x128xf32>, vector<128x1xf32>, vector<2x1xf32> -> vector<2x1xf32>
    %c0_241 = arith.constant 0 : index
    %c0_242 = arith.constant 0 : index
    %239 = vector.load %arg13[%c0_241, %c0_242] : memref<1x1xf32, #tpu.memory_space<vmem>>, vector<1x1xf32>
    %240 = vector.broadcast %239 : vector<1x1xf32> to vector<2x1xf32>
    %241 = arith.addf %238, %240 : vector<2x1xf32>
    %cst_243 = arith.constant 0.000000e+00 : f32
    %242 = vector.broadcast %cst_243 : f32 to vector<2x1xf32>
    %243 = arith.subf %242, %241 : vector<2x1xf32>
    %244 = math.exp %243 : vector<2x1xf32>
    %cst_244 = arith.constant 1.000000e+00 : f32
    %245 = vector.broadcast %cst_244 : f32 to vector<2x1xf32>
    %246 = arith.addf %245, %244 : vector<2x1xf32>
    %247 = tpu.reciprocal %246 : vector<2x1xf32> -> vector<2x1xf32>
    %248 = vector.shape_cast %247 : vector<2x1xf32> to vector<2x1xf32>
    %249 = vector.broadcast %248 : vector<2x1xf32> to vector<2x128xf32>
    %c0_245 = arith.constant 0 : index
    %c0_246 = arith.constant 0 : index
    %250 = vector.load %arg14[%c0_245, %c0_246] : memref<2x128xf32, #tpu.memory_space<vmem>>, vector<2x128xf32>
    tpu.vector_store %arg14[%c0_245, %c0_246], %249 {strides = array<i32>} : memref<2x128xf32, #tpu.memory_space<vmem>>, vector<2x128xf32>,
    return
  }
}

</mosaic_0001>

<bundles_post_ra>
// kernel: discriminator_forward.1
= control target key start
LH: loop header
LB: loop body
LE: loop exit
PB: predicated region body
PF: predicated region fallthrough
CT: control target
= control target key end

     0   :  { %vm77_vm0 = vcmask 293888   ;;  %vm126_vm1 = vcmask 1043456   ;;  %vm491_vm2 = vcmask 130048   ;;  %vm7280_vm3 = vmmov 0   ;;  %s8503_s1 = inlined_call_operand.vmem [shape: f32[36,16], index: 1, kind: input, shape index: {}]   ;;  %s8504_s0 = inlined_call_operand.vmem [shape: f32[128,36], index: 0, kind: input, shape index: {}]   ;;  %s8505_s3 = inlined_call_operand.vmem [shape: f32[9,32,128], index: 3, kind: input, shape index: {}]   ;;  %s8506_s2 = inlined_call_operand.vmem [shape: f32[1,16], index: 2, kind: input, shape index: {}]   ;;  %s8507_s4 = inlined_call_operand.vmem [shape: f32[9,16,32], index: 4, kind: input, shape index: {}]   ;;  %s8508_s5 = inlined_call_operand.vmem [shape: f32[3,32], index: 5, kind: input, shape index: {}]   ;;  %s8509_s6 = inlined_call_operand.vmem [shape: f32[9,8,32], index: 6, kind: input, shape index: {}]   ;;  %s8510_s7 = inlined_call_operand.vmem [shape: f32[9,32,64], index: 7, kind: input, shape index: {}]   ;;  %s8511_s8 = inlined_call_operand.vmem [shape: f32[3,64], index: 8, kind: input, shape index: {}]   ;;  %s8512_s10 = inlined_call_operand.vmem [shape: f32[9,64,128], index: 10, kind: input, shape index: {}]   ;;  %s8513_s9 = inlined_call_operand.vmem [shape: f32[9,2,8], index: 9, kind: input, shape index: {}]   ;;  %s8514_s12 = inlined_call_operand.vmem [shape: f32[128,1], index: 12, kind: input, shape index: {}]   ;;  %s8515_s13 = inlined_call_operand.<no memory space> [shape: f32[1,1], index: 13, kind: input, shape index: {}]   ;;  %s8516_s11 = inlined_call_operand.vmem [shape: f32[3,128], index: 11, kind: input, shape index: {}]   ;;  %s8517_s14 = inlined_call_operand.vmem [shape: f32[2,128], index: 14, kind: output, shape index: {}]  }
   0x1   :  { %v65_v0 = vld [vmem:[%s8503_s1] sm:$0xff]  ;;  %v66_v1 = vld [vmem:[%s8503_s1 + $0x8] sm:$0xff]  ;;  %v67_v2 = vld [vmem:[%s8503_s1 + $0x10] sm:$0xff]  ;;  %vm2080_vm4 = vcmask 261120   ;;  %vm3483_vm5 = vcmask 64512   ;;  %vm3649_vm6 = vcmask 523264  }
   0x2   :  { %v6666_v3 = vpack.c.bf16 %v66_v1, %v65_v0  ;;  %v68_v4 = vld [vmem:[%s8503_s1 + $0x18] sm:$0xff]  ;;  %v49_v5 = vld [vmem:[%s8504_s0] sm:$0xff]  ;;  %v50_v8 = vld [vmem:[%s8504_s0 + $0x8] sm:$0xff] }
   0x3   :  { %v6670_v6 = vpack.c.bf16 %v68_v4, %v67_v2  ;;  %5761 = vmatprep.mubr.msk.f32.mxu0 %vm77_vm0, %v49_v5  ;;  %v69_v7 = vld [vmem:[%s8503_s1 + $0x20] sm:$0xf]  ;;  %v51_v9 = vld [vmem:[%s8504_s0 + $0x10] sm:$0xff]  ;;  %v52_v10 = vld [vmem:[%s8504_s0 + $0x18] sm:$0xff] }
   0x4   :  { %6667 = vmatprep.subr.bf16.mxu0 %v6666_v3  ;;  %v53_v11 = vld [vmem:[%s8504_s0 + $0x20] sm:$0xff]  ;;  %v54_v12 = vld [vmem:[%s8504_s0 + $0x28] sm:$0xff]  ;;  %v55_v13 = vld [vmem:[%s8504_s0 + $0x30] sm:$0xff] }
   0x5   :  { %6669 = vmatpush3.bf16.msra.mxu0 %v6666_v3  ;;  %v56_v14 = vld [vmem:[%s8504_s0 + $0x38] sm:$0xff]  ;;  %v57_v15 = vld [vmem:[%s8504_s0 + $0x40] sm:$0xff]  ;;  %v58_v16 = vld [vmem:[%s8504_s0 + $0x48] sm:$0xff] }
   0x6   :  { %6671 = vmatprep.subr.bf16.mxu0 %v6670_v6  ;;  %v59_v17 = vld [vmem:[%s8504_s0 + $0x50] sm:$0xff]  ;;  %v60_v18 = vld [vmem:[%s8504_s0 + $0x58] sm:$0xff]  ;;  %v61_v19 = vld [vmem:[%s8504_s0 + $0x60] sm:$0xff] }
   0x7   :  { %v62_v20 = vld [vmem:[%s8504_s0 + $0x68] sm:$0xff]  ;;  %v63_v21 = vld [vmem:[%s8504_s0 + $0x70] sm:$0xff]  ;;  %v64_v22 = vld [vmem:[%s8504_s0 + $0x78] sm:$0xff] }
   0x8   :  { %v307_v23 = vld [vmem:[%s8505_s3] sm:$0xff] }
   0x9   :  { %6673 = vmatpush3.bf16.msra.mxu0 %v6670_v6  ;;  %v5048_v24 = vld [vmem:[%s8505_s3 + $0x20] sm:$0xff]  ;;  %5817 = vmatprep.mubr.f32.mxu1 %v307_v23 }
   0xa   :  { %5759 = vmatprep.subr.msk.mxu0 %vm126_vm1, %v69_v7  ;;  %v7446_v25 = vld [vmem:[%s8506_s2] ss:$0 sm:$0xff] }
   0xd   :  { %5760 = vmatpush3.msk.msra.mxu0 %vm126_vm1, %v69_v7 }
   0xe   :  { %5762 = vmatmul.mubr.msk.f32.vlgmr.msra.gmra.mrb[0].mxu0 %vm77_vm0, %v50_v8 }
   0xf   :  { %5764 = vmatprep.mubr.msk.f32.mxu0 %vm77_vm0, %v51_v9 }
  0x12   :  { %5765 = vmatmul.mubr.msk.f32.gmra.mrb[2].mxu0 %vm77_vm0, %v52_v10 }
  0x13   :  { %5767 = vmatprep.mubr.msk.f32.mxu0 %vm77_vm0, %v53_v11 }
  0x16   :  { %5768 = vmatmul.mubr.msk.f32.gmra.mrb[4].mxu0 %vm77_vm0, %v54_v12 }
  0x17   :  { %5770 = vmatprep.mubr.msk.f32.mxu0 %vm77_vm0, %v55_v13 }
  0x1a   :  { %5771 = vmatmul.mubr.msk.f32.gmra.mrb[6].mxu0 %vm77_vm0, %v56_v14 }
  0x1b   :  { %5773 = vmatprep.mubr.msk.f32.mxu0 %vm77_vm0, %v57_v15 }
  0x1e   :  { %5774 = vmatmul.mubr.msk.f32.gmra.mrb[8].mxu0 %vm77_vm0, %v58_v16 }
  0x1f   :  { %5776 = vmatprep.mubr.msk.f32.mxu0 %vm77_vm0, %v59_v17 }
  0x22   :  { %5777 = vmatmul.mubr.msk.f32.gmra.mrb[10].mxu0 %vm77_vm0, %v60_v18 }
  0x23   :  { %5779 = vmatprep.mubr.msk.f32.mxu0 %vm77_vm0, %v61_v19 }
  0x26   :  { %5780 = vmatmul.mubr.msk.f32.gmra.mrb[12].mxu0 %vm77_vm0, %v62_v20 }
  0x27   :  { %5782 = vmatprep.mubr.msk.f32.mxu0 %vm77_vm0, %v63_v21 }
  0x2a   :  { %5783 = vmatmul.mubr.msk.f32.gmra.mrb[14].mxu0 %vm77_vm0, %v64_v22 }
  0x2b   :  { %5855 = vmatprep.mubr.f32.mxu0 %v5048_v24 }
  0xe1   :  { %v5763_v26 = vpop.f32.mrb[0].mxu0 }
  0xe2   :  { %v202_v27 = vadd.f32 %v5763_v26, %v7446_v25  ;;  %v196_v28 = vpop.f32.mrb[1].mxu0 }
  0xe3   :  { %v197_v29 = vadd.f32 %v7446_v25, %v196_v28 }
  0xe4   :  { %v276_v30 = vmul.f32 0.2, %v202_v27 }
  0xe5   :  { %v275_v31 = vmul.f32 0.2, %v197_v29  ;;  %v5766_v32 = vpop.f32.mrb[2].mxu0 }
  0xe6   :  { %v292_v33 = vmax.f32 %v202_v27, %v276_v30  ;;  %v212_v34 = vadd.f32 %v5766_v32, %v7446_v25  ;;  %v206_v35 = vpop.f32.mrb[3].mxu0  ;;  %v5052_v32 = vld [vmem:[%s8507_s4 + $0x10] sm:$0xff] }
  0xe7   :  { %v291_v36 = vmax.f32 %v197_v29, %v275_v31  ;;  %v207_v37 = vadd.f32 %v7446_v25, %v206_v35  ;;  %v397_v35 = vld [vmem:[%s8507_s4 + $0x8] sm:$0xff] }
  0xe8   :  { %v278_v38 = vmul.f32 0.2, %v212_v34 }
  0xe9   :  { %v7452_v39 = vpack.c.bf16 %v292_v33, %v291_v36  ;;  %v277_v40 = vmul.f32 0.2, %v207_v37  ;;  %v5769_v41 = vpop.f32.mrb[4].mxu0 }
  0xea   :  { %v294_v42 = vmax.f32 %v212_v34, %v278_v38  ;;  %v222_v43 = vadd.f32 %v5769_v41, %v7446_v25  ;;  %v216_v44 = vpop.f32.mrb[5].mxu0  ;;  %v396_v34 = vld [vmem:[%s8507_s4] sm:$0xff]  ;;  %v308_v41 = vld [vmem:[%s8505_s3 + $0x8] sm:$0xff] }
  0xeb   :  { %v293_v45 = vmax.f32 %v207_v37, %v277_v40  ;;  %v217_v46 = vadd.f32 %v7446_v25, %v216_v44  ;;  %6675 = vmatprep.subr.bf16.mxu1 %v7452_v39  ;;  %6707 = vmatprep.subr.bf16.mxu0 %v7452_v39  ;;  %v6742_v40 = vpack.c.bf16 %v397_v35, %v396_v34  ;;  %v309_v44 = vld [vmem:[%s8505_s3 + $0x10] sm:$0xff]  ;;  %v5112_v34 = vld [vmem:[%s8505_s3 + $0xe0] sm:$0xff] }
  0xec   :  { %v280_v47 = vmul.f32 0.2, %v222_v43  ;;  %6677 = vmatpush3.bf16.msra.mxu1 %v7452_v39  ;;  %6709 = vmatpush3.bf16.msra.mxu0 %v7452_v39 }
  0xed   :  { %v7460_v48 = vpack.c.bf16 %v294_v42, %v293_v45  ;;  %v279_v49 = vmul.f32 0.2, %v217_v46  ;;  %v5772_v50 = vpop.f32.mrb[6].mxu0  ;;  %v5049_v42 = vld [vmem:[%s8505_s3 + $0x28] sm:$0xff]  ;;  %v5051_v45 = vld [vmem:[%s8505_s3 + $0x38] sm:$0xff] }
  0xee   :  { %v296_v51 = vmax.f32 %v222_v43, %v280_v47  ;;  %v232_v52 = vadd.f32 %v5772_v50, %v7446_v25  ;;  %v226_v53 = vpop.f32.mrb[7].mxu0  ;;  %v5050_v43 = vld [vmem:[%s8505_s3 + $0x30] sm:$0xff]  ;;  %v5066_v47 = vld [vmem:[%s8507_s4 + $0x20] sm:$0xff] }
  0xef   :  { %v295_v54 = vmax.f32 %v217_v46, %v279_v49  ;;  %v227_v55 = vadd.f32 %v7446_v25, %v226_v53  ;;  %6679 = vmatprep.subr.bf16.mxu1 %v7460_v48  ;;  %6711 = vmatprep.subr.bf16.mxu0 %v7460_v48  ;;  %v310_v46 = vld [vmem:[%s8505_s3 + $0x18] sm:$0xff]  ;;  %v5067_v49 = vld [vmem:[%s8507_s4 + $0x28] sm:$0xff] }
  0xf0   :  { %v282_v56 = vmul.f32 0.2, %v232_v52  ;;  %6681 = vmatpush3.bf16.msra.mxu1 %v7460_v48  ;;  %6713 = vmatpush3.bf16.msra.mxu0 %v7460_v48  ;;  %v6778_v50 = vpack.c.bf16 %v5067_v49, %v5066_v47  ;;  %v5096_v47 = vld [vmem:[%s8507_s4 + $0x50] sm:$0xff]  ;;  %v5097_v49 = vld [vmem:[%s8507_s4 + $0x58] sm:$0xff] }
  0xf1   :  { %v7468_v57 = vpack.c.bf16 %v296_v51, %v295_v54  ;;  %v281_v58 = vmul.f32 0.2, %v227_v55  ;;  %v5775_v59 = vpop.f32.mrb[8].mxu0 }
  0xf2   :  { %v298_v60 = vmax.f32 %v232_v52, %v282_v56  ;;  %v242_v61 = vadd.f32 %v5775_v59, %v7446_v25  ;;  %v236_v62 = vpop.f32.mrb[9].mxu0  ;;  %v5063_v59 = vld [vmem:[%s8505_s3 + $0x48] sm:$0xff] }
  0xf3   :  { %v297_v63 = vmax.f32 %v227_v55, %v281_v58  ;;  %v237_v0 = vadd.f32 %v7446_v25, %v236_v62  ;;  %6683 = vmatprep.subr.bf16.mxu1 %v7468_v57  ;;  %6715 = vmatprep.subr.bf16.mxu0 %v7468_v57  ;;  %v5062_v58 = vld [vmem:[%s8505_s3 + $0x40] sm:$0xff] }
  0xf4   :  { %v284_v1 = vmul.f32 0.2, %v242_v61  ;;  %6685 = vmatpush3.bf16.msra.mxu1 %v7468_v57  ;;  %6717 = vmatpush3.bf16.msra.mxu0 %v7468_v57  ;;  %v5082_v62 = vld [vmem:[%s8505_s3 + $0x80] sm:$0xff] }
  0xf5   :  { %v7476_v2 = vpack.c.bf16 %v298_v60, %v297_v63  ;;  %v283_v3 = vmul.f32 0.2, %v237_v0  ;;  %v5778_v4 = vpop.f32.mrb[10].mxu0  ;;  %v5064_v60 = vld [vmem:[%s8505_s3 + $0x50] sm:$0xff]  ;;  %v5083_v63 = vld [vmem:[%s8505_s3 + $0x88] sm:$0xff] }
  0xf6   :  { %v300_v5 = vmax.f32 %v242_v61, %v284_v1  ;;  %v252_v6 = vadd.f32 %v5778_v4, %v7446_v25  ;;  %v246_v7 = vpop.f32.mrb[11].mxu0  ;;  %v5065_v61 = vld [vmem:[%s8505_s3 + $0x58] sm:$0xff] }
  0xf7   :  { %v299_v8 = vmax.f32 %v237_v0, %v283_v3  ;;  %v247_v9 = vadd.f32 %v7446_v25, %v246_v7  ;;  %6687 = vmatprep.subr.bf16.mxu1 %v7476_v2  ;;  %6719 = vmatprep.subr.bf16.mxu0 %v7476_v2  ;;  %v5084_v0 = vld [vmem:[%s8505_s3 + $0x90] sm:$0xff]  ;;  %v5085_v1 = vld [vmem:[%s8505_s3 + $0x98] sm:$0xff]  ;;  %v5102_v3 = vld [vmem:[%s8505_s3 + $0xc0] sm:$0xff] }
  0xf8   :  { %v286_v10 = vmul.f32 0.2, %v252_v6  ;;  %6689 = vmatpush3.bf16.msra.mxu1 %v7476_v2  ;;  %6721 = vmatpush3.bf16.msra.mxu0 %v7476_v2 }
  0xf9   :  { %v7484_v11 = vpack.c.bf16 %v300_v5, %v299_v8  ;;  %v285_v12 = vmul.f32 0.2, %v247_v9  ;;  %v5781_v13 = vpop.f32.mrb[12].mxu0 }
  0xfa   :  { %v302_v14 = vmax.f32 %v252_v6, %v286_v10  ;;  %v262_v15 = vadd.f32 %v5781_v13, %v7446_v25  ;;  %v256_v16 = vpop.f32.mrb[13].mxu0  ;;  %v5103_v6 = vld [vmem:[%s8505_s3 + $0xc8] sm:$0xff] }
  0xfb   :  { %v301_v17 = vmax.f32 %v247_v9, %v285_v12  ;;  %v257_v18 = vadd.f32 %v7446_v25, %v256_v16  ;;  %6691 = vmatprep.subr.bf16.mxu1 %v7484_v11  ;;  %6723 = vmatprep.subr.bf16.mxu0 %v7484_v11  ;;  %v5072_v16 = vld [vmem:[%s8505_s3 + $0x60] sm:$0xff] }
  0xfc   :  { %v288_v19 = vmul.f32 0.2, %v262_v15  ;;  %6693 = vmatpush3.bf16.msra.mxu1 %v7484_v11  ;;  %6725 = vmatpush3.bf16.msra.mxu0 %v7484_v11 }
  0xfd   :  { %v7492_v20 = vpack.c.bf16 %v302_v14, %v301_v17  ;;  %v287_v21 = vmul.f32 0.2, %v257_v18  ;;  %v5784_v22 = vpop.f32.mrb[14].mxu0  ;;  %v5076_v17 = vld [vmem:[%s8507_s4 + $0x30] sm:$0xff] }
  0xfe   :  { %v304_v23 = vmax.f32 %v262_v15, %v288_v19  ;;  %v272_v24 = vadd.f32 %v5784_v22, %v7446_v25  ;;  %v266_v26 = vpop.f32.mrb[15].mxu0  ;;  %v5074_v22 = vld [vmem:[%s8505_s3 + $0x70] sm:$0xff] }
  0xff   :  { %v303_v27 = vmax.f32 %v257_v18, %v287_v21  ;;  %v267_v28 = vadd.f32 %v7446_v25, %v266_v26  ;;  %6695 = vmatprep.subr.bf16.mxu1 %v7492_v20  ;;  %6727 = vmatprep.subr.bf16.mxu0 %v7492_v20  ;;  %v5053_v25 = vld [vmem:[%s8507_s4 + $0x18] sm:$0xff]  ;;  %v5073_v21 = vld [vmem:[%s8505_s3 + $0x68] sm:$0xff] }
 0x100   :  { %v290_v29 = vmul.f32 0.2, %v272_v24  ;;  %6697 = vmatpush3.bf16.msra.mxu1 %v7492_v20  ;;  %6729 = vmatpush3.bf16.msra.mxu0 %v7492_v20  ;;  %v6738_v38 = vpack.c.bf16 %v5053_v25, %v5052_v32  ;;  %v5077_v18 = vld [vmem:[%s8507_s4 + $0x38] sm:$0xff]  ;;  %v5087_v26 = vld [vmem:[%s8507_s4 + $0x48] sm:$0xff] }
 0x101   :  { %v7500_v30 = vpack.c.bf16 %v304_v23, %v303_v27  ;;  %v289_v31 = vmul.f32 0.2, %v267_v28  ;;  %v6814_v19 = vpack.c.bf16 %v5077_v18, %v5076_v17  ;;  %v5075_v23 = vld [vmem:[%s8505_s3 + $0x78] sm:$0xff]  ;;  %v7281_v17 = vmov 0.0  }
 0x102   :  { %v306_v33 = vmax.f32 %v272_v24, %v290_v29  ;;  %v5086_v24 = vld [vmem:[%s8507_s4 + $0x40] sm:$0xff]  ;;  %v5105_v25 = vld [vmem:[%s8505_s3 + $0xd8] sm:$0xff] }
 0x103   :  { %v305_v36 = vmax.f32 %v267_v28, %v289_v31  ;;  %6699 = vmatprep.subr.bf16.mxu1 %v7500_v30  ;;  %6731 = vmatprep.subr.bf16.mxu0 %v7500_v30  ;;  %v6850_v27 = vpack.c.bf16 %v5087_v26, %v5086_v24 }
 0x104   :  { %6701 = vmatpush3.bf16.msra.mxu1 %v7500_v30  ;;  %6733 = vmatpush3.bf16.msra.mxu0 %v7500_v30 }
 0x105   :  { %v7518_v37 = vpack.c.bf16 %v306_v33, %v305_v36  ;;  %v5104_v33 = vld [vmem:[%s8505_s3 + $0xd0] sm:$0xff] }
 0x107   :  { %6703 = vmatprep.subr.bf16.mxu1 %v7518_v37  ;;  %6735 = vmatprep.subr.bf16.mxu0 %v7518_v37 }
 0x108   :  { %6705 = vmatpush3.bf16.msra.mxu1 %v7518_v37  ;;  %6737 = vmatpush3.bf16.msra.mxu0 %v7518_v37 }
 0x109   :  { %6739 = vmatprep.subr.bf16.mxu0 %v6738_v38  ;;  %6743 = vmatprep.subr.bf16.mxu1 %v6742_v40 }
 0x10b   :  { %5818 = vmatmul.mubr.f32.vlgmr.msra.gmra.mrb[0].mxu1 %v308_v41  ;;  %5856 = vmatmul.mubr.f32.vlgmr.msra.gmra.mrb[16].mxu0 %v5049_v42  ;;  %v5115_v41 = vld [vmem:[%s8505_s3 + $0xf8] sm:$0xff] }
 0x10c   :  { %6741 = vmatpush3.bf16.msra.mxu0 %v6738_v38  ;;  %5858 = vmatprep.mubr.f32.mxu0 %v5050_v43  ;;  %v5113_v38 = vld [vmem:[%s8505_s3 + $0xe8] sm:$0xff] }
 0x10d   :  { %6747 = vmatprep.subr.bf16.mxu0 %v7452_v39  ;;  %5820 = vmatprep.mubr.f32.mxu1 %v309_v44 }
 0x10e   :  { %6745 = vmatpush3.bf16.msra.mxu1 %v6742_v40  ;;  %v5114_v40 = vld [vmem:[%s8505_s3 + $0xf0] sm:$0xff] }
 0x10f   :  { %5859 = vmatmul.mubr.f32.gmra.mrb[18].mxu0 %v5051_v45  ;;  %5821 = vmatmul.mubr.f32.gmra.mrb[2].mxu1 %v310_v46  ;;  %v5092_v46 = vld [vmem:[%s8505_s3 + $0xa0] sm:$0xff] }
 0x110   :  { %6779 = vmatprep.subr.bf16.mxu1 %v6778_v50 }
 0x1de   :  { %v5819_v51 = vpop.f32.mrb[0].mxu1  ;;  %v5857_v52 = vpop.f32.mrb[16].mxu0 }
 0x1df   :  { %v377_v53 = vpop.f32.mrb[1].mxu1  ;;  %v469_v54 = vpop.f32.mrb[17].mxu0 }
 0x1e0   :  { %5865 = vmatprep.mubr.msk.f32.mxu0 %vm491_vm2, %v469_v54  ;;  %5875 = vmatprep.mubr.msk.f32.mxu1 %vm491_vm2, %v377_v53  ;;  %v5095_v53 = vld [vmem:[%s8505_s3 + $0xb8] sm:$0xff]  ;;  %v5106_v54 = vld [vmem:[%s8507_s4 + $0x60] sm:$0xff] }
 0x1e1   :  { %5866 = vmatmul.mubr.msk.f32.vlgmr.msra.gmra.mrb[20].mxu0 %vm491_vm2, %v5857_v52  ;;  %5876 = vmatmul.mubr.msk.f32.vlgmr.msra.gmra.mrb[4].mxu1 %vm491_vm2, %v5819_v51  ;;  %v5093_v51 = vld [vmem:[%s8505_s3 + $0xa8] sm:$0xff]  ;;  %v5094_v52 = vld [vmem:[%s8505_s3 + $0xb0] sm:$0xff] }
 0x1e2   :  { %6749 = vmatpush3.bf16.msra.mxu0 %v7452_v39  ;;  %6781 = vmatpush3.bf16.msra.mxu1 %v6778_v50  ;;  %v5860_v55 = vpop.f32.mrb[18].mxu0  ;;  %v5822_v4 = vpop.f32.mrb[2].mxu1  ;;  %v6886_v50 = vpack.c.bf16 %v5097_v49, %v5096_v47 }
 0x1e3   :  { %6751 = vmatprep.subr.bf16.mxu0 %v7460_v48  ;;  %6783 = vmatprep.subr.bf16.mxu1 %v7452_v39  ;;  %v479_v56 = vpop.f32.mrb[19].mxu0  ;;  %v387_v5 = vpop.f32.mrb[3].mxu1 }
 0x1e4   :  { %5868 = vmatprep.mubr.msk.f32.mxu0 %vm491_vm2, %v479_v56  ;;  %5878 = vmatprep.mubr.msk.f32.mxu1 %vm491_vm2, %v387_v5 }
 0x1e5   :  { %5869 = vmatmul.mubr.msk.f32.gmra.mrb[22].mxu0 %vm491_vm2, %v5860_v55  ;;  %5879 = vmatmul.mubr.msk.f32.gmra.mrb[6].mxu1 %vm491_vm2, %v5822_v4  ;;  %v5107_v55 = vld [vmem:[%s8507_s4 + $0x68] sm:$0xff] }
 0x1e6   :  { %6753 = vmatpush3.bf16.msra.mxu0 %v7460_v48  ;;  %5913 = vmatprep.mubr.f32.mxu0 %v5062_v58  ;;  %v6922_v56 = vpack.c.bf16 %v5107_v55, %v5106_v54  ;;  %v5136_v54 = vld [vmem:[%s8509_s6 + $0x8] sm:$0xff]  ;;  %v5151_v55 = vld [vmem:[%s8509_s6 + $0x18] sm:$0xff] }
 0x1e7   :  { %6755 = vmatprep.subr.bf16.mxu0 %v7468_v57 }
 0x1ea   :  { %6757 = vmatpush3.bf16.msra.mxu0 %v7468_v57 }
 0x1eb   :  { %6759 = vmatprep.subr.bf16.mxu0 %v7476_v2 }
 0x1ee   :  { %6761 = vmatpush3.bf16.msra.mxu0 %v7476_v2 }
 0x1ef   :  { %6763 = vmatprep.subr.bf16.mxu0 %v7484_v11 }
 0x1f2   :  { %6765 = vmatpush3.bf16.msra.mxu0 %v7484_v11 }
 0x1f3   :  { %6767 = vmatprep.subr.bf16.mxu0 %v7492_v20 }
 0x1f6   :  { %6769 = vmatpush3.bf16.msra.mxu0 %v7492_v20 }
 0x1f7   :  { %6771 = vmatprep.subr.bf16.mxu0 %v7500_v30 }
 0x1fa   :  { %6773 = vmatpush3.bf16.msra.mxu0 %v7500_v30 }
 0x1fb   :  { %6775 = vmatprep.subr.bf16.mxu0 %v7518_v37 }
 0x1fe   :  { %6777 = vmatpush3.bf16.msra.mxu0 %v7518_v37 }
 0x1ff   :  { %6819 = vmatprep.subr.bf16.mxu0 %v7452_v39 }
 0x201   :  { %5914 = vmatmul.mubr.f32.vlgmr.msra.gmra.mrb[24].mxu0 %v5063_v59 }
 0x202   :  { %6821 = vmatpush3.bf16.msra.mxu0 %v7452_v39  ;;  %5916 = vmatprep.mubr.f32.mxu0 %v5064_v60 }
 0x203   :  { %6823 = vmatprep.subr.bf16.mxu0 %v7460_v48 }
 0x205   :  { %5917 = vmatmul.mubr.f32.gmra.mrb[26].mxu0 %v5065_v61 }
 0x206   :  { %6825 = vmatpush3.bf16.msra.mxu0 %v7460_v48  ;;  %6009 = vmatprep.mubr.f32.mxu0 %v5082_v62 }
 0x207   :  { %6827 = vmatprep.subr.bf16.mxu0 %v7468_v57 }
 0x20a   :  { %6829 = vmatpush3.bf16.msra.mxu0 %v7468_v57 }
 0x20b   :  { %6831 = vmatprep.subr.bf16.mxu0 %v7476_v2 }
 0x20e   :  { %6833 = vmatpush3.bf16.msra.mxu0 %v7476_v2 }
 0x20f   :  { %6835 = vmatprep.subr.bf16.mxu0 %v7484_v11 }
 0x212   :  { %6837 = vmatpush3.bf16.msra.mxu0 %v7484_v11 }
 0x213   :  { %6839 = vmatprep.subr.bf16.mxu0 %v7492_v20 }
 0x216   :  { %6841 = vmatpush3.bf16.msra.mxu0 %v7492_v20 }
 0x217   :  { %6843 = vmatprep.subr.bf16.mxu0 %v7500_v30 }
 0x21a   :  { %6845 = vmatpush3.bf16.msra.mxu0 %v7500_v30 }
 0x21b   :  { %6847 = vmatprep.subr.bf16.mxu0 %v7518_v37 }
 0x21e   :  { %6849 = vmatpush3.bf16.msra.mxu0 %v7518_v37 }
 0x21f   :  { %6891 = vmatprep.subr.bf16.mxu0 %v7452_v39 }
 0x221   :  { %6010 = vmatmul.mubr.f32.vlgmr.msra.gmra.mrb[28].mxu0 %v5083_v63 }
 0x222   :  { %6893 = vmatpush3.bf16.msra.mxu0 %v7452_v39  ;;  %6012 = vmatprep.mubr.f32.mxu0 %v5084_v0  ;;  %v5116_v0 = vld [vmem:[%s8507_s4 + $0x70] sm:$0xff] }
 0x223   :  { %6895 = vmatprep.subr.bf16.mxu0 %v7460_v48 }
 0x225   :  { %6013 = vmatmul.mubr.f32.gmra.mrb[30].mxu0 %v5085_v1  ;;  %v5117_v1 = vld [vmem:[%s8507_s4 + $0x78] sm:$0xff] }
 0x226   :  { %6897 = vmatpush3.bf16.msra.mxu0 %v7460_v48  ;;  %6105 = vmatprep.mubr.f32.mxu0 %v5102_v3  ;;  %v6958_v5 = vpack.c.bf16 %v5117_v1, %v5116_v0  ;;  %v5140_v1 = vld [vmem:[%s8510_s7 + $0x30] sm:$0xff] }
 0x227   :  { %6899 = vmatprep.subr.bf16.mxu0 %v7468_v57 }
 0x22a   :  { %6901 = vmatpush3.bf16.msra.mxu0 %v7468_v57 }
 0x22b   :  { %6903 = vmatprep.subr.bf16.mxu0 %v7476_v2 }
 0x22e   :  { %6905 = vmatpush3.bf16.msra.mxu0 %v7476_v2 }
 0x22f   :  { %6907 = vmatprep.subr.bf16.mxu0 %v7484_v11 }
 0x232   :  { %6909 = vmatpush3.bf16.msra.mxu0 %v7484_v11 }
 0x233   :  { %6911 = vmatprep.subr.bf16.mxu0 %v7492_v20 }
 0x236   :  { %6913 = vmatpush3.bf16.msra.mxu0 %v7492_v20 }
 0x237   :  { %6915 = vmatprep.subr.bf16.mxu0 %v7500_v30 }
 0x23a   :  { %6917 = vmatpush3.bf16.msra.mxu0 %v7500_v30 }
 0x23b   :  { %6919 = vmatprep.subr.bf16.mxu0 %v7518_v37 }
 0x23e   :  { %6921 = vmatpush3.bf16.msra.mxu0 %v7518_v37 }
 0x23f   :  { %6927 = vmatprep.subr.bf16.mxu0 %v7452_v39 }
 0x241   :  { %6106 = vmatmul.mubr.f32.vlgmr.msra.gmra.mrb[32].mxu0 %v5103_v6 }
 0x242   :  { %6929 = vmatpush3.bf16.msra.mxu0 %v7452_v39  ;;  %6108 = vmatprep.mubr.f32.mxu0 %v5104_v33 }
 0x243   :  { %6931 = vmatprep.subr.bf16.mxu0 %v7460_v48 }
 0x245   :  { %6109 = vmatmul.mubr.f32.gmra.mrb[34].mxu0 %v5105_v25 }
 0x246   :  { %6933 = vmatpush3.bf16.msra.mxu0 %v7460_v48  ;;  %6153 = vmatprep.mubr.f32.mxu0 %v5112_v34 }
 0x247   :  { %6935 = vmatprep.subr.bf16.mxu0 %v7468_v57 }
 0x24a   :  { %6937 = vmatpush3.bf16.msra.mxu0 %v7468_v57 }
 0x24b   :  { %6939 = vmatprep.subr.bf16.mxu0 %v7476_v2 }
 0x24e   :  { %6941 = vmatpush3.bf16.msra.mxu0 %v7476_v2 }
 0x24f   :  { %6943 = vmatprep.subr.bf16.mxu0 %v7484_v11 }
 0x252   :  { %6945 = vmatpush3.bf16.msra.mxu0 %v7484_v11 }
 0x253   :  { %6947 = vmatprep.subr.bf16.mxu0 %v7492_v20 }
 0x256   :  { %6949 = vmatpush3.bf16.msra.mxu0 %v7492_v20 }
 0x257   :  { %6951 = vmatprep.subr.bf16.mxu0 %v7500_v30 }
 0x25a   :  { %6953 = vmatpush3.bf16.msra.mxu0 %v7500_v30 }
 0x25b   :  { %6955 = vmatprep.subr.bf16.mxu0 %v7518_v37 }
 0x25e   :  { %6957 = vmatpush3.bf16.msra.mxu0 %v7518_v37 }
 0x261   :  { %6154 = vmatmul.mubr.f32.vlgmr.msra.gmra.mrb[36].mxu0 %v5113_v38 }
 0x262   :  { %6156 = vmatprep.mubr.f32.mxu0 %v5114_v40 }
 0x265   :  { %6157 = vmatmul.mubr.f32.gmra.mrb[38].mxu0 %v5115_v41 }
 0x266   :  { %6225 = vmatprep.mubr.msk.f32.mxu0 %vm7280_vm3, %v7281_v17 }
 0x2b4   :  { %v7651_v7 = vpop.f32.mrb[20].mxu0 }
 0x2b5   :  { %v7653_v8 = vpop.f32.mrb[21].mxu0 }
 0x2b8   :  { %v7655_v9 = vpop.f32.mrb[22].mxu0 }
 0x2b9   :  { %v7657_v10 = vpop.f32.mrb[23].mxu0 }
 0x2d4   :  { %v5915_v12 = vpop.f32.mrb[24].mxu0 }
 0x2d5   :  { %v757_v13 = vpop.f32.mrb[25].mxu0 }
 0x2d6   :  { %5923 = vmatprep.mubr.msk.f32.mxu1 %vm491_vm2, %v757_v13  ;;  %v5122_v13 = vld [vmem:[%s8505_s3 + $0x100] sm:$0xff] }
 0x2d7   :  { %5924 = vmatmul.mubr.msk.f32.vlgmr.msra.gmra.mrb[4].mxu1 %vm491_vm2, %v5915_v12 }
 0x2d8   :  { %6785 = vmatpush3.bf16.msra.mxu1 %v7452_v39  ;;  %v5918_v14 = vpop.f32.mrb[26].mxu0 }
 0x2d9   :  { %6787 = vmatprep.subr.bf16.mxu1 %v7460_v48  ;;  %v767_v15 = vpop.f32.mrb[27].mxu0 }
 0x2da   :  { %5926 = vmatprep.mubr.msk.f32.mxu1 %vm491_vm2, %v767_v15 }
 0x2db   :  { %5927 = vmatmul.mubr.msk.f32.gmra.mrb[6].mxu1 %vm491_vm2, %v5918_v14 }
 0x2dc   :  { %6789 = vmatpush3.bf16.msra.mxu1 %v7460_v48  ;;  %5961 = vmatprep.mubr.f32.mxu1 %v5072_v16  ;;  %v7279_v16 = vmov 0.0|0.0  }
 0x2dd   :  { %6791 = vmatprep.subr.bf16.mxu1 %v7468_v57  ;;  %6998 = vmatprep.subr.bf16.mxu0 %v7279_v16 }
 0x2e0   :  { %6793 = vmatpush3.bf16.msra.mxu1 %v7468_v57 }
 0x2e1   :  { %6795 = vmatprep.subr.bf16.mxu1 %v7476_v2 }
 0x2e4   :  { %6797 = vmatpush3.bf16.msra.mxu1 %v7476_v2 }
 0x2e5   :  { %6799 = vmatprep.subr.bf16.mxu1 %v7484_v11 }
 0x2e8   :  { %6801 = vmatpush3.bf16.msra.mxu1 %v7484_v11 }
 0x2e9   :  { %6803 = vmatprep.subr.bf16.mxu1 %v7492_v20 }
 0x2ec   :  { %6805 = vmatpush3.bf16.msra.mxu1 %v7492_v20 }
 0x2ed   :  { %6807 = vmatprep.subr.bf16.mxu1 %v7500_v30 }
 0x2f0   :  { %6809 = vmatpush3.bf16.msra.mxu1 %v7500_v30 }
 0x2f1   :  { %6811 = vmatprep.subr.bf16.mxu1 %v7518_v37 }
 0x2f4   :  { %6813 = vmatpush3.bf16.msra.mxu1 %v7518_v37  ;;  %v6011_v28 = vpop.f32.mrb[28].mxu0 }
 0x2f5   :  { %6815 = vmatprep.subr.bf16.mxu1 %v6814_v19  ;;  %v1145_v29 = vpop.f32.mrb[29].mxu0 }
 0x2f7   :  { %5962 = vmatmul.mubr.f32.vlgmr.msra.gmra.mrb[8].mxu1 %v5073_v21 }
 0x2f8   :  { %5964 = vmatprep.mubr.f32.mxu1 %v5074_v22  ;;  %6817 = vmatpush3.bf16.msra.mxu1 %v6814_v19  ;;  %v6014_v31 = vpop.f32.mrb[30].mxu0  ;;  %v5132_v19 = vld [vmem:[%s8508_s5] ss:$0 sm:$0xff] }
 0x2f9   :  { %6851 = vmatprep.subr.bf16.mxu1 %v6850_v27  ;;  %v1155_v32 = vpop.f32.mrb[31].mxu0 }
 0x2fb   :  { %5965 = vmatmul.mubr.f32.gmra.mrb[10].mxu1 %v5075_v23 }
 0x314   :  { %v7711_v35 = vpop.f32.mrb[32].mxu0 }
 0x315   :  { %v7713_v36 = vpop.f32.mrb[33].mxu0 }
 0x318   :  { %v6110_v58 = vpop.f32.mrb[34].mxu0 }
 0x319   :  { %v1543_v59 = vpop.f32.mrb[35].mxu0 }
 0x334   :  { %v6155_v60 = vpop.f32.mrb[36].mxu0 }
 0x335   :  { %v1727_v61 = vpop.f32.mrb[37].mxu0 }
 0x338   :  { %v6158_v62 = vpop.f32.mrb[38].mxu0 }
 0x339   :  { %v1737_v63 = vpop.f32.mrb[39].mxu0 }
 0x3ca   :  { %v5963_v42 = vpop.f32.mrb[8].mxu1 }
 0x3cb   :  { %v951_v43 = vpop.f32.mrb[9].mxu1 }
 0x3cc   :  { %5971 = vmatprep.mubr.msk.f32.mxu1 %vm491_vm2, %v951_v43 }
 0x3cd   :  { %5972 = vmatmul.mubr.msk.f32.vlgmr.msra.gmra.mrb[4].mxu1 %vm491_vm2, %v5963_v42 }
 0x3ce   :  { %6853 = vmatpush3.bf16.msra.mxu1 %v6850_v27  ;;  %v5966_v44 = vpop.f32.mrb[10].mxu1 }
 0x3cf   :  { %6855 = vmatprep.subr.bf16.mxu1 %v7452_v39  ;;  %v961_v45 = vpop.f32.mrb[11].mxu1 }
 0x3d0   :  { %5974 = vmatprep.mubr.msk.f32.mxu1 %vm491_vm2, %v961_v45 }
 0x3d1   :  { %5975 = vmatmul.mubr.msk.f32.gmra.mrb[6].mxu1 %vm491_vm2, %v5966_v44 }
 0x3d2   :  { %6019 = vmatprep.mubr.msk.f32.mxu1 %vm491_vm2, %v1145_v29 }
 0x3d5   :  { %6020 = vmatmul.mubr.msk.f32.vlgmr.msra.gmra.mrb[4].mxu1 %vm491_vm2, %v6011_v28 }
 0x3d6   :  { %6857 = vmatpush3.bf16.msra.mxu1 %v7452_v39  ;;  %6022 = vmatprep.mubr.msk.f32.mxu1 %vm491_vm2, %v1155_v32  ;;  %v5133_v32 = vld [vmem:[%s8508_s5 + $0x1] ss:$0 sm:$0xff] }
 0x3d7   :  { %6859 = vmatprep.subr.bf16.mxu1 %v7460_v48 }
 0x3d9   :  { %6023 = vmatmul.mubr.msk.f32.gmra.mrb[6].mxu1 %vm491_vm2, %v6014_v31 }
 0x3da   :  { %6861 = vmatpush3.bf16.msra.mxu1 %v7460_v48  ;;  %6057 = vmatprep.mubr.f32.mxu1 %v5092_v46 }
 0x3db   :  { %6863 = vmatprep.subr.bf16.mxu1 %v7468_v57 }
 0x3de   :  { %6865 = vmatpush3.bf16.msra.mxu1 %v7468_v57 }
 0x3df   :  { %6867 = vmatprep.subr.bf16.mxu1 %v7476_v2 }
 0x3e2   :  { %6869 = vmatpush3.bf16.msra.mxu1 %v7476_v2 }
 0x3e3   :  { %6871 = vmatprep.subr.bf16.mxu1 %v7484_v11 }
 0x3e6   :  { %6873 = vmatpush3.bf16.msra.mxu1 %v7484_v11 }
 0x3e7   :  { %6875 = vmatprep.subr.bf16.mxu1 %v7492_v20 }
 0x3ea   :  { %6877 = vmatpush3.bf16.msra.mxu1 %v7492_v20 }
 0x3eb   :  { %6879 = vmatprep.subr.bf16.mxu1 %v7500_v30 }
 0x3ee   :  { %6881 = vmatpush3.bf16.msra.mxu1 %v7500_v30 }
 0x3ef   :  { %6883 = vmatprep.subr.bf16.mxu1 %v7518_v37 }
 0x3f2   :  { %6885 = vmatpush3.bf16.msra.mxu1 %v7518_v37 }
 0x3f3   :  { %6887 = vmatprep.subr.bf16.mxu1 %v6886_v50 }
 0x3f5   :  { %6058 = vmatmul.mubr.f32.vlgmr.msra.gmra.mrb[12].mxu1 %v5093_v51 }
 0x3f6   :  { %6060 = vmatprep.mubr.f32.mxu1 %v5094_v52  ;;  %6889 = vmatpush3.bf16.msra.mxu1 %v6886_v50  ;;  %v2079_v52 = vld [vmem:[%s8509_s6] sm:$0xff] }
 0x3f7   :  { %6923 = vmatprep.subr.bf16.mxu1 %v6922_v56 }
 0x3f9   :  { %6061 = vmatmul.mubr.f32.gmra.mrb[14].mxu1 %v5095_v53  ;;  %v5144_v53 = vld [vmem:[%s8509_s6 + $0x10] sm:$0xff] }
 0x4c8   :  { %v6059_v3 = vpop.f32.mrb[12].mxu1 }
 0x4c9   :  { %v1339_v4 = vpop.f32.mrb[13].mxu1 }
 0x4ca   :  { %6067 = vmatprep.mubr.msk.f32.mxu1 %vm491_vm2, %v1339_v4 }
 0x4cb   :  { %6068 = vmatmul.mubr.msk.f32.vlgmr.msra.gmra.mrb[4].mxu1 %vm491_vm2, %v6059_v3  ;;  %v5141_v3 = vld [vmem:[%s8510_s7 + $0x38] sm:$0xff] }
 0x4cc   :  { %v6062_v6 = vpop.f32.mrb[14].mxu1  ;;  %6925 = vmatpush3.bf16.msra.mxu1 %v6922_v56  ;;  %v5158_v56 = vld [vmem:[%s8509_s6 + $0x20] sm:$0xff]  ;;  %v7014_v4 = vpack.c.bf16 %v5141_v3, %v5140_v1 }
 0x4cd   :  { %v1349_v12 = vpop.f32.mrb[15].mxu1  ;;  %6959 = vmatprep.subr.bf16.mxu1 %v6958_v5  ;;  %v5188_v3 = vld [vmem:[%s8510_s7 + $0x100] sm:$0xff] }
 0x4ce   :  { %6070 = vmatprep.mubr.msk.f32.mxu1 %vm491_vm2, %v1349_v12 }
 0x4cf   :  { %6071 = vmatmul.mubr.msk.f32.gmra.mrb[6].mxu1 %vm491_vm2, %v6062_v6 }
 0x4d0   :  { %6115 = vmatprep.mubr.msk.f32.mxu1 %vm491_vm2, %v7713_v36 }
 0x4d3   :  { %6116 = vmatmul.mubr.msk.f32.vlgmr.msra.gmra.mrb[4].mxu1 %vm491_vm2, %v7711_v35 }
 0x4d4   :  { %6961 = vmatpush3.bf16.msra.mxu1 %v6958_v5  ;;  %6118 = vmatprep.mubr.msk.f32.mxu1 %vm491_vm2, %v1543_v59  ;;  %v5172_v59 = vld [vmem:[%s8509_s6 + $0x30] sm:$0xff] }
 0x4d5   :  { %6963 = vmatprep.subr.bf16.mxu1 %v7452_v39 }
 0x4d7   :  { %6119 = vmatmul.mubr.msk.f32.gmra.mrb[6].mxu1 %vm491_vm2, %v6110_v58  ;;  %v5165_v58 = vld [vmem:[%s8509_s6 + $0x28] sm:$0xff] }
 0x4d8   :  { %6163 = vmatprep.mubr.msk.f32.mxu1 %vm491_vm2, %v1727_v61  ;;  %v5186_v61 = vld [vmem:[%s8509_s6 + $0x40] sm:$0xff] }
 0x4db   :  { %6164 = vmatmul.mubr.msk.f32.vlgmr.msra.gmra.mrb[4].mxu1 %vm491_vm2, %v6155_v60  ;;  %v5179_v60 = vld [vmem:[%s8509_s6 + $0x38] sm:$0xff] }
 0x4dc   :  { %6965 = vmatpush3.bf16.msra.mxu1 %v7452_v39  ;;  %6166 = vmatprep.mubr.msk.f32.mxu1 %vm491_vm2, %v1737_v63  ;;  %v5126_v39 = vld [vmem:[%s8507_s4 + $0x80] sm:$0xff]  ;;  %v5139_v63 = vld [vmem:[%s8510_s7 + $0x28] sm:$0xff] }
 0x4dd   :  { %6967 = vmatprep.subr.bf16.mxu1 %v7460_v48 }
 0x4df   :  { %6167 = vmatmul.mubr.msk.f32.gmra.mrb[6].mxu1 %vm491_vm2, %v6158_v62  ;;  %v5138_v62 = vld [vmem:[%s8510_s7 + $0x20] sm:$0xff] }
 0x4e0   :  { %6969 = vmatpush3.bf16.msra.mxu1 %v7460_v48  ;;  %6201 = vmatprep.mubr.f32.mxu1 %v5122_v13  ;;  %v5127_v48 = vld [vmem:[%s8507_s4 + $0x88] sm:$0xff]  ;;  %v7011_v0 = vpack.c.bf16 %v5139_v63, %v5138_v62  ;;  %v5183_v63 = vld [vmem:[%s8510_s7 + $0xf0] sm:$0xff] }
 0x4e1   :  { %6971 = vmatprep.subr.bf16.mxu1 %v7468_v57 }
 0x4e4   :  { %6973 = vmatpush3.bf16.msra.mxu1 %v7468_v57  ;;  %v6994_v57 = vpack.c.bf16 %v5127_v48, %v5126_v39  ;;  %v2154_v39 = vld [vmem:[%s8510_s7] sm:$0xff]  ;;  %v2155_v48 = vld [vmem:[%s8510_s7 + $0x8] sm:$0xff] }
 0x4e5   :  { %6975 = vmatprep.subr.bf16.mxu1 %v7476_v2 }
 0x4e8   :  { %6977 = vmatpush3.bf16.msra.mxu1 %v7476_v2  ;;  %v5123_v2 = vld [vmem:[%s8505_s3 + $0x108] sm:$0xff] }
 0x4e9   :  { %6979 = vmatprep.subr.bf16.mxu1 %v7484_v11 }
 0x4ec   :  { %6981 = vmatpush3.bf16.msra.mxu1 %v7484_v11  ;;  %v5124_v11 = vld [vmem:[%s8505_s3 + $0x110] sm:$0xff] }
 0x4ed   :  { %6983 = vmatprep.subr.bf16.mxu1 %v7492_v20 }
 0x4f0   :  { %6985 = vmatpush3.bf16.msra.mxu1 %v7492_v20  ;;  %v5125_v20 = vld [vmem:[%s8505_s3 + $0x118] sm:$0xff] }
 0x4f1   :  { %6987 = vmatprep.subr.bf16.mxu1 %v7500_v30 }
 0x4f4   :  { %6989 = vmatpush3.bf16.msra.mxu1 %v7500_v30 }
 0x4f5   :  { %6991 = vmatprep.subr.bf16.mxu1 %v7518_v37 }
 0x4f8   :  { %6993 = vmatpush3.bf16.msra.mxu1 %v7518_v37 }
 0x4f9   :  { %6995 = vmatprep.subr.bf16.mxu1 %v6994_v57 }
 0x4fb   :  { %6202 = vmatmul.mubr.f32.vlgmr.msra.gmra.mrb[16].mxu1 %v5123_v2  ;;  %v2156_v2 = vld [vmem:[%s8510_s7 + $0x10] sm:$0xff] }
 0x4fc   :  { %6204 = vmatprep.mubr.f32.mxu1 %v5124_v11  ;;  %6997 = vmatpush3.bf16.msra.mxu1 %v6994_v57  ;;  %v7017_v57 = vpack.c.bf16 %v2155_v48, %v2154_v39  ;;  %v2157_v11 = vld [vmem:[%s8510_s7 + $0x18] sm:$0xff] }
 0x4fd   :  { %7022 = vmatprep.subr.bf16.mxu1 %v7279_v16 }
 0x4ff   :  { %6205 = vmatmul.mubr.f32.gmra.mrb[18].mxu1 %v5125_v20 }
 0x5ce   :  { %v6203_v30 = vpop.f32.mrb[16].mxu1 }
 0x5cf   :  { %v1921_v14 = vpop.f32.mrb[17].mxu1 }
 0x5d0   :  { %6211 = vmatprep.mubr.msk.f32.mxu1 %vm491_vm2, %v1921_v14 }
 0x5d1   :  { %6212 = vmatmul.mubr.msk.f32.vlgmr.msra.gmra.mrb[4].mxu1 %vm491_vm2, %v6203_v30 }
 0x5d2   :  { %v6206_v37 = vpop.f32.mrb[18].mxu1 }
 0x5d3   :  { %v1931_v15 = vpop.f32.mrb[19].mxu1 }
 0x5d4   :  { %6214 = vmatprep.mubr.msk.f32.mxu1 %vm491_vm2, %v1931_v15  ;;  %v7020_v15 = vpack.c.bf16 %v2157_v11, %v2156_v2 }
 0x5d5   :  { %6215 = vmatmul.mubr.msk.f32.gmra.mrb[6].mxu1 %vm491_vm2, %v6206_v37 }
 0x5d6   :  { %6269 = vmatprep.mubr.msk.f32.mxu1 %vm7280_vm3, %v7281_v17 }
 0x6a4   :  { %v6213_v18 = vpop.f32.mrb[4].mxu1 }
 0x6a5   :  { %v7238_v21 = vadd.f32 %v6213_v18, %v7651_v7  ;;  %v2021_v22 = vpop.f32.mrb[5].mxu1  ;;  %v5134_v7 = vld [vmem:[%s8508_s5 + $0x2] ss:$0 sm:$0xff] }
 0x6a6   :  { %v7239_v23 = vadd.f32 %v2021_v22, %v7653_v8  ;;  %v5146_v18 = vld [vmem:[%s8510_s7 + $0x40] sm:$0xff]  ;;  %v5148_v22 = vld [vmem:[%s8510_s7 + $0x50] sm:$0xff] }
 0x6a7   :  { %v2050_v24 = vadd.f32 %v7238_v21, %v5132_v19 }
 0x6a8   :  { %v2049_v26 = vadd.f32 %v7239_v23, %v5132_v19  ;;  %v6216_v27 = vpop.f32.mrb[6].mxu1  ;;  %v5149_v23 = vld [vmem:[%s8510_s7 + $0x58] sm:$0xff] }
 0x6a9   :  { %v2054_v28 = vmul.f32 0.2, %v2050_v24  ;;  %v7240_v29 = vadd.f32 %v6216_v27, %v7655_v9  ;;  %v2031_v31 = vpop.f32.mrb[7].mxu1  ;;  %v7032_v27 = vpack.c.bf16 %v5149_v23, %v5148_v22 }
 0x6aa   :  { %v2053_v33 = vmul.f32 0.2, %v2049_v26  ;;  %v7241_v25 = vadd.f32 %v2031_v31, %v7657_v10 }
 0x6ab   :  { %v2058_v34 = vmax.f32 %v2050_v24, %v2054_v28  ;;  %v2052_v35 = vadd.f32 %v7240_v29, %v5132_v19  ;;  %v5153_v28 = vld [vmem:[%s8510_s7 + $0x60] sm:$0xff]  ;;  %v5154_v29 = vld [vmem:[%s8510_s7 + $0x68] sm:$0xff] }
 0x6ac   :  { %v2057_v8 = vmax.f32 %v2049_v26, %v2053_v33  ;;  %v2051_v36 = vadd.f32 %v7241_v25, %v5132_v19  ;;  %v5147_v19 = vld [vmem:[%s8510_s7 + $0x48] sm:$0xff]  ;;  %v7041_v31 = vpack.c.bf16 %v5154_v29, %v5153_v28  ;;  %v5156_v33 = vld [vmem:[%s8510_s7 + $0x78] sm:$0xff] }
 0x6ad   :  { %v2067_v38 = vmul.f32 %v5133_v32, %v2058_v34  ;;  %v2056_v40 = vmul.f32 0.2, %v2052_v35  ;;  %v7029_v21 = vpack.c.bf16 %v5147_v19, %v5146_v18 }
 0x6ae   :  { %v2066_v41 = vmul.f32 %v5133_v32, %v2057_v8  ;;  %v2055_v9 = vmul.f32 0.2, %v2051_v36  ;;  %v5161_v8 = vld [vmem:[%s8510_s7 + $0x88] sm:$0xff] }
 0x6af   :  { %v2076_v42 = vadd.f32 %v5134_v7, %v2067_v38  ;;  %v2060_v43 = vmax.f32 %v2052_v35, %v2056_v40  ;;  %v5162_v38 = vld [vmem:[%s8510_s7 + $0x90] sm:$0xff]  ;;  %v5163_v40 = vld [vmem:[%s8510_s7 + $0x98] sm:$0xff] }
 0x6b0   :  { %v2075_v44 = vadd.f32 %v5134_v7, %v2066_v41  ;;  %v2059_v45 = vmax.f32 %v2051_v36, %v2055_v9 }
 0x6b1   :  { %v2069_v46 = vmul.f32 %v5133_v32, %v2060_v43  ;;  %v5167_v43 = vld [vmem:[%s8510_s7 + $0xa0] sm:$0xff] }
 0x6b2   :  { %v6999_v47 = vpack.c.bf16 %v2076_v42, %v2075_v44  ;;  %v2068_v49 = vmul.f32 %v5133_v32, %v2059_v45  ;;  %v5155_v32 = vld [vmem:[%s8510_s7 + $0x70] sm:$0xff]  ;;  %v7056_v42 = vpack.c.bf16 %v5163_v40, %v5162_v38  ;;  %v5168_v44 = vld [vmem:[%s8510_s7 + $0xa8] sm:$0xff]  ;;  %v5194_v38 = vld [vmem:[%s8511_s8 + $0x1] ss:$0 sm:$0xff] }
 0x6b3   :  { %v2078_v10 = vadd.f32 %v5134_v7, %v2069_v46  ;;  %v7044_v35 = vpack.c.bf16 %v5156_v33, %v5155_v32  ;;  %v7065_v45 = vpack.c.bf16 %v5168_v44, %v5167_v43  ;;  %v5169_v46 = vld [vmem:[%s8510_s7 + $0xb0] sm:$0xff]  ;;  %v5200_v43 = vld [vmem:[%s8512_s10 + $0x48] sm:$0xff]  ;;  %v3557_v44 = vld [vmem:[%s8512_s10] sm:$0xff] }
 0x6b4   :  { %v2077_v50 = vadd.f32 %v5134_v7, %v2068_v49  ;;  %7000 = vmatpush3.bf16.msra.mxu0 %v6999_v47  ;;  %7024 = vmatpush3.bf16.msra.mxu1 %v6999_v47  ;;  %v5160_v7 = vld [vmem:[%s8510_s7 + $0x80] sm:$0xff] }
 0x6b5   :  { %7001 = vmatprep.subr.bf16.mxu0 %v7279_v16  ;;  %7025 = vmatprep.subr.bf16.mxu1 %v7279_v16  ;;  %v7053_v36 = vpack.c.bf16 %v5161_v8, %v5160_v7 }
 0x6b6   :  { %v7002_v51 = vpack.c.bf16 %v2078_v10, %v2077_v50 }
 0x6b8   :  { %7003 = vmatpush3.bf16.msra.mxu0 %v7002_v51  ;;  %7027 = vmatpush3.bf16.msra.mxu1 %v7002_v51 }
 0x6b9   :  { %7004 = vmatprep.subr.bf16.mxu0 %v7279_v16  ;;  %7034 = vmatprep.subr.bf16.mxu1 %v7279_v16 }
 0x6bb   :  { %6226 = vmatmul.mubr.msk.f32.vlgmr.msra.gmra.mrb[40].mxu0 %vm2080_vm4, %v2079_v52  ;;  %6270 = vmatmul.mubr.msk.f32.vlgmr.msra.gmra.mrb[20].mxu1 %vm2080_vm4, %v5144_v53  ;;  %v5175_v52 = vld [vmem:[%s8510_s7 + $0xc8] sm:$0xff] }
 0x6bc   :  { %7006 = vmatpush3.bf16.msra.mxu0 %v6999_v47  ;;  %7036 = vmatpush3.bf16.msra.mxu1 %v6999_v47 }
 0x6bd   :  { %7007 = vmatprep.subr.bf16.mxu0 %v7279_v16  ;;  %7037 = vmatprep.subr.bf16.mxu1 %v7279_v16 }
 0x6be   :  { %6236 = vmatprep.mubr.msk.f32.mxu0 %vm7280_vm3, %v7281_v17  ;;  %6291 = vmatprep.mubr.msk.f32.mxu1 %vm7280_vm3, %v7281_v17 }
 0x6c0   :  { %7009 = vmatpush3.bf16.msra.mxu0 %v7002_v51  ;;  %7039 = vmatpush3.bf16.msra.mxu1 %v7002_v51 }
 0x6c1   :  { %7046 = vmatprep.subr.bf16.mxu1 %v7279_v16  ;;  %7010 = vmatprep.subr.bf16.mxu0 %v7279_v16 }
 0x6c3   :  { %6237 = vmatmul.mubr.msk.f32.vlgmr.msra.gmra.mrb[42].mxu0 %vm2080_vm4, %v5136_v54  ;;  %6292 = vmatmul.mubr.msk.f32.vlgmr.msra.gmra.mrb[22].mxu1 %vm2080_vm4, %v5151_v55  ;;  %v5176_v54 = vld [vmem:[%s8510_s7 + $0xd0] sm:$0xff]  ;;  %v5177_v55 = vld [vmem:[%s8510_s7 + $0xd8] sm:$0xff] }
 0x6c4   :  { %7048 = vmatpush3.bf16.msra.mxu1 %v6999_v47  ;;  %6313 = vmatprep.mubr.msk.f32.mxu1 %vm7280_vm3, %v7281_v17 }
 0x6c5   :  { %7049 = vmatprep.subr.bf16.mxu1 %v7279_v16  ;;  %6247 = vmatprep.mubr.msk.f32.mxu0 %vm7280_vm3, %v7281_v17 }
 0x6c6   :  { %7012 = vmatpush3.bf16.msra.mxu0 %v7011_v0  ;;  %v5184_v0 = vld [vmem:[%s8510_s7 + $0xf8] sm:$0xff] }
 0x6c7   :  { %7013 = vmatprep.subr.bf16.mxu0 %v7279_v16  ;;  %v7092_v1 = vpack.c.bf16 %v5184_v0, %v5183_v63  ;;  %v5205_v0 = vld [vmem:[%s8512_s10 + $0x70] sm:$0xff] }
 0x6c8   :  { %7051 = vmatpush3.bf16.msra.mxu1 %v7002_v51 }
 0x6c9   :  { %7058 = vmatprep.subr.bf16.mxu1 %v7279_v16 }
 0x6ca   :  { %7015 = vmatpush3.bf16.msra.mxu0 %v7014_v4  ;;  %v5189_v4 = vld [vmem:[%s8510_s7 + $0x108] sm:$0xff] }
 0x6cb   :  { %6314 = vmatmul.mubr.msk.f32.vlgmr.msra.gmra.mrb[24].mxu1 %vm2080_vm4, %v5158_v56  ;;  %7016 = vmatprep.subr.bf16.mxu0 %v7279_v16 }
 0x6cc   :  { %7060 = vmatpush3.bf16.msra.mxu1 %v6999_v47  ;;  %6335 = vmatprep.mubr.msk.f32.mxu1 %vm7280_vm3, %v7281_v17 }
 0x6cd   :  { %7061 = vmatprep.subr.bf16.mxu1 %v7279_v16 }
 0x6d0   :  { %7063 = vmatpush3.bf16.msra.mxu1 %v7002_v51 }
 0x6d1   :  { %7070 = vmatprep.subr.bf16.mxu1 %v7279_v16 }
 0x6d3   :  { %6336 = vmatmul.mubr.msk.f32.vlgmr.msra.gmra.mrb[26].mxu1 %vm2080_vm4, %v5165_v58 }
 0x6d4   :  { %7072 = vmatpush3.bf16.msra.mxu1 %v6999_v47  ;;  %6357 = vmatprep.mubr.msk.f32.mxu1 %vm7280_vm3, %v7281_v17 }
 0x6d5   :  { %7073 = vmatprep.subr.bf16.mxu1 %v7279_v16 }
 0x6d8   :  { %7075 = vmatpush3.bf16.msra.mxu1 %v7002_v51 }
 0x6d9   :  { %7082 = vmatprep.subr.bf16.mxu1 %v7279_v16 }
 0x6db   :  { %6358 = vmatmul.mubr.msk.f32.vlgmr.msra.gmra.mrb[28].mxu1 %vm2080_vm4, %v5172_v59  ;;  %v7080_v59 = vpack.c.bf16 %v5177_v55, %v5176_v54  ;;  %v3560_v54 = vld [vmem:[%s8512_s10 + $0x18] sm:$0xff] }
 0x6dc   :  { %7084 = vmatpush3.bf16.msra.mxu1 %v6999_v47  ;;  %6379 = vmatprep.mubr.msk.f32.mxu1 %vm7280_vm3, %v7281_v17 }
 0x6dd   :  { %7085 = vmatprep.subr.bf16.mxu1 %v7279_v16 }
 0x6e0   :  { %7087 = vmatpush3.bf16.msra.mxu1 %v7002_v51 }
 0x6e1   :  { %7094 = vmatprep.subr.bf16.mxu1 %v7279_v16 }
 0x6e3   :  { %6380 = vmatmul.mubr.msk.f32.vlgmr.msra.gmra.mrb[30].mxu1 %vm2080_vm4, %v5179_v60  ;;  %v5181_v60 = vld [vmem:[%s8510_s7 + $0xe0] sm:$0xff] }
 0x6e4   :  { %7096 = vmatpush3.bf16.msra.mxu1 %v6999_v47  ;;  %6401 = vmatprep.mubr.msk.f32.mxu1 %vm7280_vm3, %v7281_v17  ;;  %v5170_v47 = vld [vmem:[%s8510_s7 + $0xb8] sm:$0xff] }
 0x6e5   :  { %7097 = vmatprep.subr.bf16.mxu1 %v7279_v16  ;;  %v7068_v50 = vpack.c.bf16 %v5170_v47, %v5169_v46  ;;  %v5197_v47 = vld [vmem:[%s8513_s9 + $0x2] sm:$0x3] }
 0x6e8   :  { %7099 = vmatpush3.bf16.msra.mxu1 %v7002_v51  ;;  %v5174_v51 = vld [vmem:[%s8510_s7 + $0xc0] sm:$0xff] }
 0x6e9   :  { %6415 = vmatprep.subr.mxu1 %v7281_v17  ;;  %v7077_v53 = vpack.c.bf16 %v5175_v52, %v5174_v51  ;;  %v5202_v52 = vld [vmem:[%s8512_s10 + $0x58] sm:$0xff] }
 0x6eb   :  { %6402 = vmatmul.mubr.msk.f32.vlgmr.msra.gmra.mrb[32].mxu1 %vm2080_vm4, %v5186_v61  ;;  %v5182_v61 = vld [vmem:[%s8510_s7 + $0xe8] sm:$0xff] }
 0x6ec   :  { %6417 = vmatprep.mubr.msk.f32.mxu1 %vm7280_vm3, %v7281_v17  ;;  %v7089_v62 = vpack.c.bf16 %v5182_v61, %v5181_v60  ;;  %v3561_v60 = vld [vmem:[%s8512_s10 + $0x20] sm:$0xff]  ;;  %v3562_v61 = vld [vmem:[%s8512_s10 + $0x28] sm:$0xff] }
 0x6ed   :  { %v7125_v63 = vpack.c.bf16 %v3562_v61, %v3561_v60  ;;  %v5247_v60 = vld [vmem:[%s8512_s10 + $0x158] sm:$0xff]  ;;  %v5237_v61 = vld [vmem:[%s8512_s10 + $0x120] sm:$0xff] }
 0x78e   :  { %v2150_v5 = vpop.f32.mrb[40].mxu0  ;;  %v2455_v6 = vpop.f32.mrb[20].mxu1 }
 0x78f   :  { %v6227_v12 = vpop.f32.mrb[41].mxu0  ;;  %v6271_v13 = vpop.f32.mrb[21].mxu1 }
 0x790   :  { %v5191_v12 = vld [vmem:[%s8510_s7 + $0x118] sm:$0xff] }
 0x796   :  { %v2229_v20 = vpop.f32.mrb[42].mxu0  ;;  %v2609_v30 = vpop.f32.mrb[22].mxu1 }
 0x797   :  { %v6238_v14 = vpop.f32.mrb[43].mxu0  ;;  %6248 = vmatmul.mubr.msk.f32.vlgmr.msra.gmra.mrb[44].mxu0 %vm2080_vm4, %v2229_v20  ;;  %v6293_v37 = vpop.f32.mrb[23].mxu1 }
 0x798   :  { %7018 = vmatpush3.bf16.msra.mxu0 %v7017_v57  ;;  %6258 = vmatprep.mubr.msk.f32.mxu0 %vm7280_vm3, %v7281_v17 }
 0x799   :  { %7019 = vmatprep.subr.bf16.mxu0 %v7279_v16 }
 0x79c   :  { %7021 = vmatpush3.bf16.msra.mxu0 %v7020_v15 }
 0x79d   :  { %7028 = vmatprep.subr.bf16.mxu0 %v7279_v16 }
 0x79e   :  { %v2763_v24 = vpop.f32.mrb[24].mxu1 }
 0x79f   :  { %6259 = vmatmul.mubr.msk.f32.vlgmr.msra.gmra.mrb[46].mxu0 %vm2080_vm4, %v2150_v5  ;;  %v6315_v26 = vpop.f32.mrb[25].mxu1  ;;  %v7101_v5 = vpack.c.bf16 %v5189_v4, %v5188_v3  ;;  %v3563_v4 = vld [vmem:[%s8512_s10 + $0x30] sm:$0xff] }
 0x7a0   :  { %7030 = vmatpush3.bf16.msra.mxu0 %v7029_v21  ;;  %6280 = vmatprep.mubr.msk.f32.mxu0 %vm7280_vm3, %v7281_v17 }
 0x7a1   :  { %7031 = vmatprep.subr.bf16.mxu0 %v7279_v16 }
 0x7a4   :  { %7033 = vmatpush3.bf16.msra.mxu0 %v7032_v27 }
 0x7a5   :  { %7040 = vmatprep.subr.bf16.mxu0 %v7279_v16 }
 0x7a6   :  { %v2917_v25 = vpop.f32.mrb[26].mxu1 }
 0x7a7   :  { %6281 = vmatmul.mubr.msk.f32.vlgmr.msra.gmra.mrb[48].mxu0 %vm2080_vm4, %v2455_v6  ;;  %v6337_v34 = vpop.f32.mrb[27].mxu1  ;;  %v5190_v6 = vld [vmem:[%s8510_s7 + $0x110] sm:$0xff] }
 0x7a8   :  { %7042 = vmatpush3.bf16.msra.mxu0 %v7041_v31  ;;  %6302 = vmatprep.mubr.msk.f32.mxu0 %vm7280_vm3, %v7281_v17  ;;  %v7104_v13 = vpack.c.bf16 %v5191_v12, %v5190_v6  ;;  %v5193_v34 = vld [vmem:[%s8511_s8] ss:$0 sm:$0xff] }
 0x7a9   :  { %7043 = vmatprep.subr.bf16.mxu0 %v7279_v16  ;;  %v5211_v12 = vld [vmem:[%s8512_s10 + $0x80] sm:$0xff] }
 0x7ac   :  { %7045 = vmatpush3.bf16.msra.mxu0 %v7044_v35 }
 0x7ad   :  { %7052 = vmatprep.subr.bf16.mxu0 %v7279_v16 }
 0x7ae   :  { %v3071_v41 = vpop.f32.mrb[28].mxu1 }
 0x7af   :  { %6303 = vmatmul.mubr.msk.f32.vlgmr.msra.gmra.mrb[50].mxu0 %vm2080_vm4, %v2609_v30  ;;  %v6359_v9 = vpop.f32.mrb[29].mxu1 }
 0x7b0   :  { %7054 = vmatpush3.bf16.msra.mxu0 %v7053_v36  ;;  %6324 = vmatprep.mubr.msk.f32.mxu0 %vm7280_vm3, %v7281_v17  ;;  %v5199_v9 = vld [vmem:[%s8512_s10 + $0x40] sm:$0xff] }
 0x7b1   :  { %7055 = vmatprep.subr.bf16.mxu0 %v7279_v16 }
 0x7b4   :  { %7057 = vmatpush3.bf16.msra.mxu0 %v7056_v42 }
 0x7b5   :  { %7064 = vmatprep.subr.bf16.mxu0 %v7279_v16 }
 0x7b6   :  { %v3225_v49 = vpop.f32.mrb[30].mxu1 }
 0x7b7   :  { %6325 = vmatmul.mubr.msk.f32.vlgmr.msra.gmra.mrb[52].mxu0 %vm2080_vm4, %v2763_v24  ;;  %v6381_v10 = vpop.f32.mrb[31].mxu1 }
 0x7b8   :  { %7066 = vmatpush3.bf16.msra.mxu0 %v7065_v45  ;;  %6346 = vmatprep.mubr.msk.f32.mxu0 %vm7280_vm3, %v7281_v17  ;;  %v3558_v45 = vld [vmem:[%s8512_s10 + $0x8] sm:$0xff]  ;;  %v7107_v10 = vpack.c.bf16 %v5200_v43, %v5199_v9  ;;  %v5233_v43 = vld [vmem:[%s8512_s10 + $0x100] sm:$0xff] }
 0x7b9   :  { %7067 = vmatprep.subr.bf16.mxu0 %v7279_v16  ;;  %v7119_v51 = vpack.c.bf16 %v3558_v45, %v3557_v44  ;;  %v5234_v44 = vld [vmem:[%s8512_s10 + $0x108] sm:$0xff] }
 0x7bc   :  { %7069 = vmatpush3.bf16.msra.mxu0 %v7068_v50  ;;  %v5201_v50 = vld [vmem:[%s8512_s10 + $0x50] sm:$0xff] }
 0x7bd   :  { %7076 = vmatprep.subr.bf16.mxu0 %v7279_v16  ;;  %v7110_v55 = vpack.c.bf16 %v5202_v52, %v5201_v50  ;;  %v5245_v50 = vld [vmem:[%s8512_s10 + $0x148] sm:$0xff]  ;;  %v5235_v52 = vld [vmem:[%s8512_s10 + $0x110] sm:$0xff] }
 0x7be   :  { %v3379_v56 = vpop.f32.mrb[32].mxu1 }
 0x7bf   :  { %6347 = vmatmul.mubr.msk.f32.vlgmr.msra.gmra.mrb[54].mxu0 %vm2080_vm4, %v2917_v25  ;;  %v6403_v58 = vpop.f32.mrb[33].mxu1 }
 0x7c0   :  { %7078 = vmatpush3.bf16.msra.mxu0 %v7077_v53  ;;  %6368 = vmatprep.mubr.msk.f32.mxu0 %vm7280_vm3, %v7281_v17  ;;  %v3559_v53 = vld [vmem:[%s8512_s10 + $0x10] sm:$0xff] }
 0x7c1   :  { %7079 = vmatprep.subr.bf16.mxu0 %v7279_v16  ;;  %v7122_v58 = vpack.c.bf16 %v3560_v54, %v3559_v53  ;;  %v5236_v53 = vld [vmem:[%s8512_s10 + $0x118] sm:$0xff] }
 0x7c4   :  { %7081 = vmatpush3.bf16.msra.mxu0 %v7080_v59  ;;  %v5204_v59 = vld [vmem:[%s8512_s10 + $0x68] sm:$0xff] }
 0x7c5   :  { %7088 = vmatprep.subr.bf16.mxu0 %v7279_v16 }
 0x7c7   :  { %6369 = vmatmul.mubr.msk.f32.vlgmr.msra.gmra.mrb[56].mxu0 %vm2080_vm4, %v3071_v41  ;;  %v5195_v41 = vld [vmem:[%s8511_s8 + $0x2] ss:$0 sm:$0xff] }
 0x7c8   :  { %7090 = vmatpush3.bf16.msra.mxu0 %v7089_v62  ;;  %6390 = vmatprep.mubr.msk.f32.mxu0 %vm7280_vm3, %v7281_v17 }
 0x7c9   :  { %7091 = vmatprep.subr.bf16.mxu0 %v7279_v16 }
 0x7cc   :  { %7093 = vmatpush3.bf16.msra.mxu0 %v7092_v1  ;;  %v5206_v1 = vld [vmem:[%s8512_s10 + $0x78] sm:$0xff] }
 0x7cd   :  { %7100 = vmatprep.subr.bf16.mxu0 %v7279_v16  ;;  %v7116_v3 = vpack.c.bf16 %v5206_v1, %v5205_v0  ;;  %v5239_v1 = vld [vmem:[%s8512_s10 + $0x130] sm:$0xff] }
 0x7cf   :  { %6391 = vmatmul.mubr.msk.f32.vlgmr.msra.gmra.mrb[58].mxu0 %vm2080_vm4, %v3225_v49  ;;  %v3482_v49 = vld [vmem:[%s8513_s9] sm:$0x3] }
 0x7d0   :  { %7102 = vmatpush3.bf16.msra.mxu0 %v7101_v5  ;;  %6412 = vmatprep.mubr.msk.f32.mxu0 %vm7280_vm3, %v7281_v17  ;;  %v3564_v5 = vld [vmem:[%s8512_s10 + $0x38] sm:$0xff] }
 0x7d1   :  { %7103 = vmatprep.subr.bf16.mxu0 %v7279_v16  ;;  %v7128_v6 = vpack.c.bf16 %v3564_v5, %v3563_v4  ;;  %v5248_v4 = vld [vmem:[%s8512_s10 + $0x160] sm:$0xff] }
 0x7d4   :  { %7105 = vmatpush3.bf16.msra.mxu0 %v7104_v13  ;;  %v5212_v13 = vld [vmem:[%s8512_s10 + $0x88] sm:$0xff] }
 0x7d5   :  { %6420 = vmatprep.subr.mxu0 %v7281_v17 }
 0x7d7   :  { %6413 = vmatmul.mubr.msk.f32.vlgmr.msra.gmra.mrb[60].mxu0 %vm2080_vm4, %v3379_v56  ;;  %v5203_v56 = vld [vmem:[%s8512_s10 + $0x60] sm:$0xff] }
 0x7d8   :  { %6422 = vmatprep.mubr.msk.f32.mxu0 %vm7280_vm3, %v7281_v17  ;;  %v7113_v62 = vpack.c.bf16 %v5204_v59, %v5203_v56  ;;  %v5246_v59 = vld [vmem:[%s8512_s10 + $0x150] sm:$0xff] }
 0x86a   :  { %v2307_v39 = vpop.f32.mrb[44].mxu0 }
 0x86b   :  { %v6249_v48 = vpop.f32.mrb[45].mxu0 }
 0x872   :  { %v2380_v57 = vpop.f32.mrb[46].mxu0 }
 0x873   :  { %v2381_v2 = vadd.f32 %v2380_v57, %v2307_v39  ;;  %v6260_v11 = vpop.f32.mrb[47].mxu0  ;;  %v7131_v39 = vpack.c.bf16 %v5212_v13, %v5211_v12  ;;  %v5250_v13 = vld [vmem:[%s8512_s10 + $0x170] sm:$0xff] }
 0x874   :  { %v5214_v11 = vld [vmem:[%s8512_s10 + $0x98] sm:$0xff] }
 0x87a   :  { %v2533_v20 = vpop.f32.mrb[48].mxu0 }
 0x87b   :  { %v2537_v30 = vadd.f32 %v2533_v20, %v2381_v2  ;;  %v6282_v14 = vpop.f32.mrb[49].mxu0  ;;  %v5213_v2 = vld [vmem:[%s8512_s10 + $0x90] sm:$0xff] }
 0x87c   :  { %v5209_v14 = vld [vmem:[%s8513_s9 + $0x4] sm:$0x3] }
 0x882   :  { %v2687_v37 = vpop.f32.mrb[50].mxu0 }
 0x883   :  { %v2691_v15 = vadd.f32 %v2687_v37, %v2537_v30  ;;  %v6304_v18 = vpop.f32.mrb[51].mxu0  ;;  %v7134_v37 = vpack.c.bf16 %v5214_v11, %v5213_v2 }
 0x884   :  { %v5223_v18 = vld [vmem:[%s8512_s10 + $0xc8] sm:$0xff] }
 0x88a   :  { %v2841_v19 = vpop.f32.mrb[52].mxu0 }
 0x88b   :  { %v2845_v21 = vadd.f32 %v2841_v19, %v2691_v15  ;;  %v6326_v22 = vpop.f32.mrb[53].mxu0  ;;  %v5222_v15 = vld [vmem:[%s8512_s10 + $0xc0] sm:$0xff] }
 0x88c   :  { %v5215_v19 = vld [vmem:[%s8512_s10 + $0xa0] sm:$0xff] }
 0x88d   :  { %v5220_v22 = vld [vmem:[%s8513_s9 + $0x6] sm:$0x3] }
 0x892   :  { %v2995_v23 = vpop.f32.mrb[54].mxu0 }
 0x893   :  { %v2999_v24 = vadd.f32 %v2995_v23, %v2845_v21  ;;  %v6348_v26 = vpop.f32.mrb[55].mxu0  ;;  %v5216_v21 = vld [vmem:[%s8512_s10 + $0xa8] sm:$0xff]  ;;  %v7143_v23 = vpack.c.bf16 %v5223_v18, %v5222_v15 }
 0x894   :  { %v5224_v26 = vld [vmem:[%s8512_s10 + $0xd0] sm:$0xff] }
 0x89a   :  { %v3149_v27 = vpop.f32.mrb[56].mxu0 }
 0x89b   :  { %v3153_v28 = vadd.f32 %v3149_v27, %v2999_v24  ;;  %v6370_v29 = vpop.f32.mrb[57].mxu0  ;;  %v7137_v24 = vpack.c.bf16 %v5216_v21, %v5215_v19  ;;  %v5225_v27 = vld [vmem:[%s8512_s10 + $0xd8] sm:$0xff]  ;;  %v5253_v21 = vld [vmem:[%s8513_s9 + $0xc] sm:$0x3] }
 0x89c   :  { %v5218_v29 = vld [vmem:[%s8512_s10 + $0xb8] sm:$0xff] }
 0x8a2   :  { %v3303_v31 = vpop.f32.mrb[58].mxu0 }
 0x8a3   :  { %v3307_v32 = vadd.f32 %v3303_v31, %v3153_v28  ;;  %v6392_v33 = vpop.f32.mrb[59].mxu0  ;;  %v5217_v28 = vld [vmem:[%s8512_s10 + $0xb0] sm:$0xff]  ;;  %v7146_v31 = vpack.c.bf16 %v5225_v27, %v5224_v26 }
 0x8a4   :  { %v5226_v33 = vld [vmem:[%s8512_s10 + $0xe0] sm:$0xff]  ;;  %v5257_v27 = vld [vmem:[%s8512_s10 + $0x190] sm:$0xff] }
 0x8aa   :  { %v3457_v25 = vpop.f32.mrb[60].mxu0 }
 0x8ab   :  { %v3461_v35 = vadd.f32 %v3457_v25, %v3307_v32  ;;  %v6414_v7 = vpop.f32.mrb[61].mxu0  ;;  %v7140_v32 = vpack.c.bf16 %v5218_v29, %v5217_v28  ;;  %v5227_v25 = vld [vmem:[%s8512_s10 + $0xe8] sm:$0xff]  ;;  %v5258_v28 = vld [vmem:[%s8512_s10 + $0x198] sm:$0xff] }
 0x8ac   :  { %v5229_v7 = vld [vmem:[%s8512_s10 + $0xf8] sm:$0xff] }
 0x8ad   :  { %v3467_v8 = vadd.f32 %v5193_v34, %v3461_v35  ;;  %v7149_v34 = vpack.c.bf16 %v5227_v25, %v5226_v33  ;;  %v5228_v35 = vld [vmem:[%s8512_s10 + $0xf0] sm:$0xff]  ;;  %v7182_v33 = vpack.c.bf16 %v5258_v28, %v5257_v27 }
 0x8ae   :  { %v5268_v25 = vld [vmem:[%s8512_s10 + $0x1d0] sm:$0xff] }
 0x8af   :  { %v3468_v36 = vmul.f32 0.2, %v3467_v8 }
 0x8b1   :  { %v3469_v40 = vmax.f32 %v3467_v8, %v3468_v36  ;;  %v7152_v8 = vpack.c.bf16 %v5229_v7, %v5228_v35  ;;  %v5259_v35 = vld [vmem:[%s8512_s10 + $0x1a0] sm:$0xff]  ;;  %v5260_v7 = vld [vmem:[%s8512_s10 + $0x1a8] sm:$0xff] }
 0x8b3   :  { %v3475_v42 = vmul.f32 %v5194_v38, %v3469_v40 }
 0x8b5   :  { %v8095_v46 = vadd.f32 %v5195_v41, %v3475_v42 }
 0x8b7   :  { %6416 = vmatpush3.msra.mxu1 %v8095_v46  ;;  %6421 = vmatpush3.msra.mxu0 %v8095_v46 }
 0x8b8   :  { %6423 = vmatmul.mubr.msk.f32.vlgmr.msra.gmra.mrb[62].mxu0 %vm3483_vm5, %v5197_v47  ;;  %6418 = vmatmul.mubr.msk.f32.vlgmr.msra.gmra.mrb[34].mxu1 %vm3483_vm5, %v3482_v49  ;;  %v5231_v47 = vld [vmem:[%s8513_s9 + $0x8] sm:$0x3]  ;;  %v7155_v49 = vpack.c.bf16 %v5234_v44, %v5233_v43  ;;  %v5272_v44 = vld [vmem:[%s8512_s10 + $0x1f0] sm:$0xff] }
 0x8b9   :  { %7106 = vmatprep.subr.bf16.mxu1 %v7279_v16  ;;  %7118 = vmatprep.subr.bf16.mxu0 %v7279_v16 }
 0x8ba   :  { %7108 = vmatpush3.bf16.msra.mxu1 %v7107_v10  ;;  %7120 = vmatpush3.bf16.msra.mxu0 %v7119_v51  ;;  %v5244_v10 = vld [vmem:[%s8512_s10 + $0x140] sm:$0xff] }
 0x8bb   :  { %7109 = vmatprep.subr.bf16.mxu1 %v7279_v16  ;;  %7121 = vmatprep.subr.bf16.mxu0 %v7279_v16  ;;  %v7167_v56 = vpack.c.bf16 %v5245_v50, %v5244_v10 }
 0x8bc   :  { %6441 = vmatprep.mubr.msk.f32.mxu1 %vm7280_vm3, %v7281_v17  ;;  %6460 = vmatprep.mubr.msk.f32.mxu0 %vm7280_vm3, %v7281_v17 }
 0x8be   :  { %7111 = vmatpush3.bf16.msra.mxu1 %v7110_v55  ;;  %7123 = vmatpush3.bf16.msra.mxu0 %v7122_v58  ;;  %v5242_v55 = vld [vmem:[%s8513_s9 + $0xa] sm:$0x3]  ;;  %v7158_v58 = vpack.c.bf16 %v5236_v53, %v5235_v52 }
 0x8bf   :  { %7112 = vmatprep.subr.bf16.mxu1 %v7279_v16  ;;  %7124 = vmatprep.subr.bf16.mxu0 %v7279_v16  ;;  %v5278_v52 = vld [vmem:[%s8512_s10 + $0x208] sm:$0xff] }
 0x8c2   :  { %7114 = vmatpush3.bf16.msra.mxu1 %v7113_v62  ;;  %7126 = vmatpush3.bf16.msra.mxu0 %v7125_v63  ;;  %v5238_v62 = vld [vmem:[%s8512_s10 + $0x128] sm:$0xff]  ;;  %v7170_v63 = vpack.c.bf16 %v5247_v60, %v5246_v59  ;;  %v5275_v59 = vld [vmem:[%s8513_s9 + $0x10] sm:$0x3] }
 0x8c3   :  { %7115 = vmatprep.subr.bf16.mxu1 %v7279_v16  ;;  %7127 = vmatprep.subr.bf16.mxu0 %v7279_v16  ;;  %v7161_v0 = vpack.c.bf16 %v5238_v62, %v5237_v61  ;;  %v5279_v61 = vld [vmem:[%s8512_s10 + $0x210] sm:$0xff]  ;;  %v5280_v62 = vld [vmem:[%s8512_s10 + $0x218] sm:$0xff] }
 0x8c6   :  { %7117 = vmatpush3.bf16.msra.mxu1 %v7116_v3  ;;  %7129 = vmatpush3.bf16.msra.mxu0 %v7128_v6  ;;  %v5240_v3 = vld [vmem:[%s8512_s10 + $0x138] sm:$0xff]  ;;  %v5249_v6 = vld [vmem:[%s8512_s10 + $0x168] sm:$0xff] }
 0x8c7   :  { %6463 = vmatprep.subr.mxu1 %v7281_v17  ;;  %7130 = vmatprep.subr.bf16.mxu0 %v7279_v16  ;;  %v7164_v5 = vpack.c.bf16 %v5240_v3, %v5239_v1  ;;  %v7173_v12 = vpack.c.bf16 %v5249_v6, %v5248_v4  ;;  %v5281_v1 = vld [vmem:[%s8512_s10 + $0x220] sm:$0xff]  ;;  %v5282_v3 = vld [vmem:[%s8512_s10 + $0x228] sm:$0xff]  ;;  %v5284_v6 = vld [vmem:[%s8512_s10 + $0x238] sm:$0xff] }
 0x8c8   :  { %v7209_v4 = vpack.c.bf16 %v5282_v3, %v5281_v1 }
 0x98b   :  { %v3636_v48 = vpop.f32.mrb[62].mxu0  ;;  %v3553_v57 = vpop.f32.mrb[34].mxu1 }
 0x98c   :  { %6442 = vmatmul.mubr.msk.f32.vlgmr.msra.gmra.mrb[36].mxu1 %vm3649_vm6, %v3636_v48  ;;  %v6424_v20 = vpop.f32.mrb[63].mxu0  ;;  %6461 = vmatmul.mubr.msk.f32.vlgmr.msra.gmra.mrb[64].mxu0 %vm3649_vm6, %v3553_v57  ;;  %v6419_v30 = vpop.f32.mrb[35].mxu1 }
 0x98d   :  { %6464 = vmatpush3.msra.mxu1 %v8095_v46  ;;  %6465 = vmatprep.mubr.msk.f32.mxu1 %vm7280_vm3, %v7281_v17 }
 0x98e   :  { %6487 = vmatprep.subr.mxu1 %v7281_v17  ;;  %7132 = vmatpush3.bf16.msra.mxu0 %v7131_v39  ;;  %v5251_v39 = vld [vmem:[%s8512_s10 + $0x178] sm:$0xff] }
 0x98f   :  { %7133 = vmatprep.subr.bf16.mxu0 %v7279_v16  ;;  %6484 = vmatprep.mubr.msk.f32.mxu0 %vm7280_vm3, %v7281_v17  ;;  %v7176_v48 = vpack.c.bf16 %v5251_v39, %v5250_v13  ;;  %v4923_v13 = vld [vmem:[%s8514_s12 + $0x8] sm:$0xff]  ;;  %v4924_v39 = vld [vmem:[%s8514_s12 + $0x10] sm:$0xff] }
 0x990   :  { %6466 = vmatmul.mubr.msk.f32.vlgmr.msra.gmra.mrb[38].mxu1 %vm3483_vm5, %v5209_v14  ;;  %v5255_v14 = vld [vmem:[%s8512_s10 + $0x180] sm:$0xff] }
 0x991   :  { %6488 = vmatpush3.msra.mxu1 %v8095_v46  ;;  %6489 = vmatprep.mubr.msk.f32.mxu1 %vm7280_vm3, %v7281_v17 }
 0x992   :  { %7142 = vmatprep.subr.bf16.mxu1 %v7279_v16  ;;  %7135 = vmatpush3.bf16.msra.mxu0 %v7134_v37  ;;  %v5256_v37 = vld [vmem:[%s8512_s10 + $0x188] sm:$0xff] }
 0x993   :  { %7136 = vmatprep.subr.bf16.mxu0 %v7279_v16 }
 0x994   :  { %6490 = vmatmul.mubr.msk.f32.vlgmr.msra.gmra.mrb[40].mxu1 %vm3483_vm5, %v5220_v22  ;;  %v7179_v22 = vpack.c.bf16 %v5256_v37, %v5255_v14  ;;  %v4928_v14 = vld [vmem:[%s8514_s12 + $0x30] sm:$0xff]  ;;  %v4929_v37 = vld [vmem:[%s8514_s12 + $0x38] sm:$0xff] }
 0x995   :  { %7144 = vmatpush3.bf16.msra.mxu1 %v7143_v23  ;;  %6508 = vmatprep.mubr.msk.f32.mxu1 %vm7280_vm3, %v7281_v17  ;;  %v5266_v23 = vld [vmem:[%s8512_s10 + $0x1c0] sm:$0xff] }
 0x996   :  { %7145 = vmatprep.subr.bf16.mxu1 %v7279_v16  ;;  %7138 = vmatpush3.bf16.msra.mxu0 %v7137_v24  ;;  %v5267_v24 = vld [vmem:[%s8512_s10 + $0x1c8] sm:$0xff] }
 0x997   :  { %7139 = vmatprep.subr.bf16.mxu0 %v7279_v16 }
 0x999   :  { %7147 = vmatpush3.bf16.msra.mxu1 %v7146_v31  ;;  %v5264_v31 = vld [vmem:[%s8513_s9 + $0xe] sm:$0x3] }
 0x99a   :  { %7148 = vmatprep.subr.bf16.mxu1 %v7279_v16  ;;  %7141 = vmatpush3.bf16.msra.mxu0 %v7140_v32  ;;  %v7191_v32 = vpack.c.bf16 %v5267_v24, %v5266_v23 }
 0x99b   :  { %6511 = vmatprep.subr.mxu0 %v7281_v17 }
 0x99d   :  { %7150 = vmatpush3.bf16.msra.mxu1 %v7149_v34  ;;  %v5269_v34 = vld [vmem:[%s8512_s10 + $0x1d8] sm:$0xff] }
 0x99e   :  { %7151 = vmatprep.subr.bf16.mxu1 %v7279_v16 }
 0x9a1   :  { %7153 = vmatpush3.bf16.msra.mxu1 %v7152_v8  ;;  %v7194_v8 = vpack.c.bf16 %v5269_v34, %v5268_v25  ;;  %v4934_v34 = vld [vmem:[%s8514_s12 + $0x60] sm:$0xff] }
 0x9a2   :  { %6535 = vmatprep.subr.mxu1 %v7281_v17 }
 0xa5f   :  { %v3719_v36 = vpop.f32.mrb[36].mxu1  ;;  %v3792_v38 = vpop.f32.mrb[64].mxu0 }
 0xa60   :  { %v6443_v40 = vpop.f32.mrb[37].mxu1  ;;  %v3793_v41 = vadd.f32 %v3792_v38, %v3719_v36  ;;  %v6462_v9 = vpop.f32.mrb[65].mxu0  ;;  %v7185_v36 = vpack.c.bf16 %v5260_v7, %v5259_v35  ;;  %v5261_v38 = vld [vmem:[%s8512_s10 + $0x1b0] sm:$0xff]  ;;  %v4935_v35 = vld [vmem:[%s8514_s12 + $0x68] sm:$0xff] }
 0xa61   :  { %v5262_v40 = vld [vmem:[%s8512_s10 + $0x1b8] sm:$0xff]  ;;  %v5270_v9 = vld [vmem:[%s8512_s10 + $0x1e0] sm:$0xff]  ;;  %v7233_v7 = vpack.c.bf16 %v4935_v35, %v4934_v34 }
 0xa63   :  { %v3867_v42 = vpop.f32.mrb[38].mxu1 }
 0xa64   :  { %6485 = vmatmul.mubr.msk.f32.vlgmr.msra.gmra.mrb[66].mxu0 %vm3649_vm6, %v3867_v42  ;;  %v6467_v45 = vpop.f32.mrb[39].mxu1  ;;  %v5271_v42 = vld [vmem:[%s8512_s10 + $0x1e8] sm:$0xff] }
 0xa65   :  { %6512 = vmatpush3.msra.mxu0 %v8095_v46  ;;  %6513 = vmatprep.mubr.msk.f32.mxu0 %vm7280_vm3, %v7281_v17  ;;  %v7197_v43 = vpack.c.bf16 %v5271_v42, %v5270_v9  ;;  %v5273_v45 = vld [vmem:[%s8512_s10 + $0x1f8] sm:$0xff] }
 0xa66   :  { %7154 = vmatprep.subr.bf16.mxu0 %v7279_v16 }
 0xa67   :  { %v4025_v51 = vpop.f32.mrb[40].mxu1 }
 0xa68   :  { %6509 = vmatmul.mubr.msk.f32.vlgmr.msra.gmra.mrb[42].mxu1 %vm3649_vm6, %v4025_v51  ;;  %6514 = vmatmul.mubr.msk.f32.vlgmr.msra.gmra.mrb[68].mxu0 %vm3483_vm5, %v5231_v47  ;;  %v6491_v54 = vpop.f32.mrb[41].mxu1  ;;  %v7200_v47 = vpack.c.bf16 %v5273_v45, %v5272_v44  ;;  %v5277_v51 = vld [vmem:[%s8512_s10 + $0x200] sm:$0xff] }
 0xa69   :  { %6536 = vmatpush3.msra.mxu1 %v8095_v46  ;;  %6537 = vmatprep.mubr.msk.f32.mxu1 %vm7280_vm3, %v7281_v17  ;;  %v7203_v60 = vpack.c.bf16 %v5278_v52, %v5277_v51  ;;  %v5287_v45 = vld [vmem:[%s8516_s11 + $0x1] ss:$0 sm:$0xff]  ;;  %v7282_v51 = vmov 0  }
 0xa6a   :  { %7156 = vmatpush3.bf16.msra.mxu0 %v7155_v49  ;;  %7166 = vmatprep.subr.bf16.mxu1 %v7279_v16 }
 0xa6b   :  { %7157 = vmatprep.subr.bf16.mxu0 %v7279_v16  ;;  %6532 = vmatprep.mubr.msk.f32.mxu0 %vm7280_vm3, %v7281_v17 }
 0xa6c   :  { %6538 = vmatmul.mubr.msk.f32.vlgmr.msra.gmra.mrb[44].mxu1 %vm3483_vm5, %v5242_v55  ;;  %7274 = vset.pattern.permute.xlu0 %v7282_v51 }
 0xa6d   :  { %7168 = vmatpush3.bf16.msra.mxu1 %v7167_v56  ;;  %6556 = vmatprep.mubr.msk.f32.mxu1 %vm7280_vm3, %v7281_v17 }
 0xa6e   :  { %7159 = vmatpush3.bf16.msra.mxu0 %v7158_v58  ;;  %7169 = vmatprep.subr.bf16.mxu1 %v7279_v16 }
 0xa6f   :  { %7160 = vmatprep.subr.bf16.mxu0 %v7279_v16 }
 0xa71   :  { %7171 = vmatpush3.bf16.msra.mxu1 %v7170_v63 }
 0xa72   :  { %7162 = vmatpush3.bf16.msra.mxu0 %v7161_v0  ;;  %7172 = vmatprep.subr.bf16.mxu1 %v7279_v16  ;;  %v7206_v0 = vpack.c.bf16 %v5280_v62, %v5279_v61 }
 0xa73   :  { %7163 = vmatprep.subr.bf16.mxu0 %v7279_v16 }
 0xa75   :  { %7174 = vmatpush3.bf16.msra.mxu1 %v7173_v12 }
 0xa76   :  { %7165 = vmatpush3.bf16.msra.mxu0 %v7164_v5  ;;  %7175 = vmatprep.subr.bf16.mxu1 %v7279_v16  ;;  %v5283_v5 = vld [vmem:[%s8512_s10 + $0x230] sm:$0xff] }
 0xa77   :  { %6559 = vmatprep.subr.mxu0 %v7281_v17  ;;  %v7212_v12 = vpack.c.bf16 %v5284_v6, %v5283_v5 }
 0xa79   :  { %7177 = vmatpush3.bf16.msra.mxu1 %v7176_v48 }
 0xa7a   :  { %6583 = vmatprep.subr.mxu1 %v7281_v17 }
 0xb37   :  { %v3949_v57 = vpop.f32.mrb[66].mxu0 }
 0xb38   :  { %v3953_v2 = vadd.f32 %v3949_v57, %v3793_v41  ;;  %v6486_v11 = vpop.f32.mrb[67].mxu0  ;;  %v7188_v41 = vpack.c.bf16 %v5262_v40, %v5261_v38  ;;  %v4925_v57 = vld [vmem:[%s8514_s12 + $0x18] sm:$0xff]  ;;  %v19_v40 = vstv %s8515_s13 }
 0xb39   :  { %v4926_v11 = vld [vmem:[%s8514_s12 + $0x20] sm:$0xff]  ;;  %20 = vst [vmem:[#allocation2] sm:$0x1] %v19_v40 }
 0xb3b   :  { %v4107_v20 = vpop.f32.mrb[42].mxu1  ;;  %v4183_v30 = vpop.f32.mrb[68].mxu0 }
 0xb3c   :  { %v4111_v15 = vadd.f32 %v4107_v20, %v3953_v2  ;;  %6533 = vmatmul.mubr.msk.f32.vlgmr.msra.gmra.mrb[70].mxu0 %vm3649_vm6, %v4183_v30  ;;  %v6510_v18 = vpop.f32.mrb[43].mxu1  ;;  %v6515_v19 = vpop.f32.mrb[69].mxu0  ;;  %v7218_v2 = vpack.c.bf16 %v4925_v57, %v4924_v39  ;;  %v4927_v20 = vld [vmem:[%s8514_s12 + $0x28] sm:$0xff] }
 0xb3d   :  { %6560 = vmatpush3.msra.mxu0 %v8095_v46  ;;  %6561 = vmatprep.mubr.msk.f32.mxu0 %vm7280_vm3, %v7281_v17  ;;  %v7221_v30 = vpack.c.bf16 %v4927_v20, %v4926_v11  ;;  %v4930_v18 = vld [vmem:[%s8514_s12 + $0x40] sm:$0xff]  ;;  %v4931_v19 = vld [vmem:[%s8514_s12 + $0x48] sm:$0xff] }
 0xb3e   :  { %7178 = vmatprep.subr.bf16.mxu0 %v7279_v16 }
 0xb3f   :  { %v4341_v26 = vpop.f32.mrb[44].mxu1 }
 0xb40   :  { %6557 = vmatmul.mubr.msk.f32.vlgmr.msra.gmra.mrb[46].mxu1 %vm3649_vm6, %v4341_v26  ;;  %6562 = vmatmul.mubr.msk.f32.vlgmr.msra.gmra.mrb[72].mxu0 %vm3483_vm5, %v5253_v21  ;;  %v6539_v29 = vpop.f32.mrb[45].mxu1  ;;  %v7227_v21 = vpack.c.bf16 %v4931_v19, %v4930_v18  ;;  %v5289_v52 = vld [vmem:[#allocation2] ss:$0 sm:$0xff] }
 0xb41   :  { %6584 = vmatpush3.msra.mxu1 %v8095_v46  ;;  %6585 = vmatprep.mubr.msk.f32.mxu1 %vm7280_vm3, %v7281_v17 }
 0xb42   :  { %7180 = vmatpush3.bf16.msra.mxu0 %v7179_v22  ;;  %7190 = vmatprep.subr.bf16.mxu1 %v7279_v16 }
 0xb43   :  { %7181 = vmatprep.subr.bf16.mxu0 %v7279_v16  ;;  %6580 = vmatprep.mubr.msk.f32.mxu0 %vm7280_vm3, %v7281_v17 }
 0xb44   :  { %6586 = vmatmul.mubr.msk.f32.vlgmr.msra.gmra.mrb[48].mxu1 %vm3483_vm5, %v5264_v31 }
 0xb45   :  { %7192 = vmatpush3.bf16.msra.mxu1 %v7191_v32  ;;  %6604 = vmatprep.mubr.msk.f32.mxu1 %vm7280_vm3, %v7281_v17  ;;  %v4932_v32 = vld [vmem:[%s8514_s12 + $0x50] sm:$0xff] }
 0xb46   :  { %7183 = vmatpush3.bf16.msra.mxu0 %v7182_v33  ;;  %7193 = vmatprep.subr.bf16.mxu1 %v7279_v16  ;;  %v4933_v33 = vld [vmem:[%s8514_s12 + $0x58] sm:$0xff] }
 0xb47   :  { %7184 = vmatprep.subr.bf16.mxu0 %v7279_v16  ;;  %v7230_v25 = vpack.c.bf16 %v4933_v33, %v4932_v32 }
 0xb49   :  { %7195 = vmatpush3.bf16.msra.mxu1 %v7194_v8  ;;  %v4936_v8 = vld [vmem:[%s8514_s12 + $0x70] sm:$0xff] }
 0xb4a   :  { %7186 = vmatpush3.bf16.msra.mxu0 %v7185_v36  ;;  %7196 = vmatprep.subr.bf16.mxu1 %v7279_v16  ;;  %v4937_v36 = vld [vmem:[%s8514_s12 + $0x78] sm:$0xff] }
 0xb4b   :  { %7187 = vmatprep.subr.bf16.mxu0 %v7279_v16  ;;  %v7236_v38 = vpack.c.bf16 %v4937_v36, %v4936_v8 }
 0xb4d   :  { %7198 = vmatpush3.bf16.msra.mxu1 %v7197_v43 }
 0xb4e   :  { %7189 = vmatpush3.bf16.msra.mxu0 %v7188_v41  ;;  %7199 = vmatprep.subr.bf16.mxu1 %v7279_v16 }
 0xb4f   :  { %6607 = vmatprep.subr.mxu0 %v7281_v17 }
 0xb51   :  { %7201 = vmatpush3.bf16.msra.mxu1 %v7200_v47 }
 0xb52   :  { %7214 = vmatprep.subr.bf16.mxu1 %v7279_v16 }
 0xc0f   :  { %v4265_v49 = vpop.f32.mrb[70].mxu0 }
 0xc10   :  { %v4269_v10 = vadd.f32 %v4265_v49, %v4111_v15  ;;  %v6534_v50 = vpop.f32.mrb[71].mxu0  ;;  %v7224_v15 = vpack.c.bf16 %v4929_v37, %v4928_v14  ;;  %v5288_v49 = vld [vmem:[%s8516_s11 + $0x2] ss:$0 sm:$0xff] }
 0xc13   :  { %v4423_v53 = vpop.f32.mrb[46].mxu1  ;;  %v4499_v54 = vpop.f32.mrb[72].mxu0 }
 0xc14   :  { %v4427_v55 = vadd.f32 %v4423_v53, %v4269_v10  ;;  %6581 = vmatmul.mubr.msk.f32.vlgmr.msra.gmra.mrb[74].mxu0 %vm3649_vm6, %v4499_v54  ;;  %v6558_v56 = vpop.f32.mrb[47].mxu1  ;;  %v6563_v58 = vpop.f32.mrb[73].mxu0 }
 0xc15   :  { %6608 = vmatpush3.msra.mxu0 %v8095_v46  ;;  %6609 = vmatprep.mubr.msk.f32.mxu0 %vm7280_vm3, %v7281_v17 }
 0xc16   :  { %7202 = vmatprep.subr.bf16.mxu0 %v7279_v16 }
 0xc17   :  { %v4657_v63 = vpop.f32.mrb[48].mxu1 }
 0xc18   :  { %6605 = vmatmul.mubr.msk.f32.vlgmr.msra.gmra.mrb[50].mxu1 %vm3649_vm6, %v4657_v63  ;;  %6610 = vmatmul.mubr.msk.f32.vlgmr.msra.gmra.mrb[76].mxu0 %vm3483_vm5, %v5275_v59  ;;  %v6587_v46 = vpop.f32.mrb[49].mxu1 }
 0xc19   :  { %7204 = vmatpush3.bf16.msra.mxu0 %v7203_v60  ;;  %6628 = vmatprep.mubr.msk.f32.mxu0 %vm7280_vm3, %v7281_v17 }
 0xc1a   :  { %7205 = vmatprep.subr.bf16.mxu0 %v7279_v16  ;;  %6663 = vmatprep.mubr.msk.f32.mxu1 %vm7280_vm3, %v7281_v17  ;;  %v4922_v17 = vld [vmem:[%s8514_s12] sm:$0xff] }
 0xc1b   :  { %v7215_v48 = vpack.c.bf16 %v4923_v13, %v4922_v17 }
 0xc1d   :  { %7207 = vmatpush3.bf16.msra.mxu0 %v7206_v0  ;;  %7216 = vmatpush3.bf16.msra.mxu1 %v7215_v48 }
 0xc1e   :  { %7208 = vmatprep.subr.bf16.mxu0 %v7279_v16  ;;  %7217 = vmatprep.subr.bf16.mxu1 %v7279_v16 }
 0xc21   :  { %7210 = vmatpush3.bf16.msra.mxu0 %v7209_v4  ;;  %7219 = vmatpush3.bf16.msra.mxu1 %v7218_v2 }
 0xc22   :  { %7211 = vmatprep.subr.bf16.mxu0 %v7279_v16  ;;  %7220 = vmatprep.subr.bf16.mxu1 %v7279_v16 }
 0xc25   :  { %7213 = vmatpush3.bf16.msra.mxu0 %v7212_v12  ;;  %7222 = vmatpush3.bf16.msra.mxu1 %v7221_v30 }
 0xc26   :  { %7223 = vmatprep.subr.bf16.mxu1 %v7279_v16 }
 0xc29   :  { %7225 = vmatpush3.bf16.msra.mxu1 %v7224_v15 }
 0xc2a   :  { %7226 = vmatprep.subr.bf16.mxu1 %v7279_v16 }
 0xc2d   :  { %7228 = vmatpush3.bf16.msra.mxu1 %v7227_v21 }
 0xc2e   :  { %7229 = vmatprep.subr.bf16.mxu1 %v7279_v16 }
 0xc31   :  { %7231 = vmatpush3.bf16.msra.mxu1 %v7230_v25 }
 0xc32   :  { %7232 = vmatprep.subr.bf16.mxu1 %v7279_v16 }
 0xc35   :  { %7234 = vmatpush3.bf16.msra.mxu1 %v7233_v7 }
 0xc36   :  { %7235 = vmatprep.subr.bf16.mxu1 %v7279_v16  ;;  %v5286_v16 = vld [vmem:[%s8516_s11] ss:$0 sm:$0xff] }
 0xc39   :  { %7237 = vmatpush3.bf16.msra.mxu1 %v7236_v38 }
 0xce7   :  { %v4581_v22 = vpop.f32.mrb[74].mxu0 }
 0xce8   :  { %v4585_v23 = vadd.f32 %v4581_v22, %v4427_v55  ;;  %v6582_v24 = vpop.f32.mrb[75].mxu0 }
 0xceb   :  { %v4739_v26 = vpop.f32.mrb[50].mxu1  ;;  %v4815_v27 = vpop.f32.mrb[76].mxu0 }
 0xcec   :  { %v4743_v28 = vadd.f32 %v4739_v26, %v4585_v23  ;;  %6629 = vmatmul.mubr.msk.f32.vlgmr.msra.gmra.mrb[78].mxu0 %vm3649_vm6, %v4815_v27  ;;  %v6611_v29 = vpop.f32.mrb[77].mxu0  ;;  %v6606_v31 = vpop.f32.mrb[51].mxu1 }
 0xdbf   :  { %v4897_v41 = vpop.f32.mrb[78].mxu0 }
 0xdc0   :  { %v4901_v9 = vadd.f32 %v4897_v41, %v4743_v28  ;;  %v6630_v42 = vpop.f32.mrb[79].mxu0 }
 0xdc2   :  { %v4907_v43 = vadd.f32 %v5286_v16, %v4901_v9 }
 0xdc4   :  { %v4908_v44 = vmul.f32 0.2, %v4907_v43 }
 0xdc6   :  { %v4909_v47 = vmax.f32 %v4907_v43, %v4908_v44 }
 0xdc8   :  { %v4915_v10 = vmul.f32 %v5287_v45, %v4909_v47 }
 0xdca   :  { %v4921_v50 = vadd.f32 %v5288_v49, %v4915_v10 }
 0xdcc   :  { %6664 = vmatmul.mubr.f32.vlgmr.msra.gmra.mrb[52].mxu1 %v4921_v50 }
 0xe9f   :  { %v5011_v53 = vpop.f32.mrb[52].mxu1 }
 0xea0   :  { %v5012_v54 = vadd.f32 %v5289_v52, %v5011_v53  ;;  %v6665_v55 = vpop.f32.mrb[53].mxu1 }
 0xea2   :  { %v5015_v56 = vsub.f32 0.0, %v5012_v54 }
 0xea4   :  { %v5016_v58 = vmul.f32 1.442695, %v5015_v56 }
 0xea6   :  { %7275 = vpow2.f32 %v5016_v58 }
 0xeb0   :  { %v7276_v59 = vpop.eup %7275 }
 0xeb1   :  { %v5018_v60 = vadd.f32 1.0, %v7276_v59 }
 0xeb3   :  { %7277 = vrcp.f32 %v5018_v60 }
 0xebd   :  { %v7278_v61 = vpop.eup %7277 }
 0xebe   :  { %5022 = vperm.xlu0 %7274, %v7278_v61  }
 0xf3d   :  { %v5023_v62 = vpop.permute.xlu0 %5022 }
 0xf3e   :  { %5025 = vst [vmem:[%s8517_s14] sm:$0x3] %v5023_v62 }

</bundles_post_ra>
